<compile_context>
chip_gen: v5e
topology: v5e:2x2
jax: 0.10.0
libtpu: 0.0.40
codegen_flags: <defaults>
</compile_context>

<pallas_src>
import math

import jax
import jax.numpy as jnp
from jax import lax
from jax.experimental import pallas as pl
from jax.experimental.pallas import tpu as pltpu

# ---- small model dims consistent with the module ----
B, S, H = 2, 8, 32          # batch, seq (plays the role of the hardcoded 100), hidden
NH, HD = 4, 8               # attention heads, head dim  (NH*HD == H)
I = 64                      # FFN intermediate size
L = 5                       # num_labels
LPAD = 128                  # classifier logits padded to a full lane group
COUNT = 3                   # HSUM count
LN_EPS = 1e-12
T = B * S                   # folded batch*seq rows


# ----------------------------- Pallas kernel --------------------------------
def _layernorm(x, g, b):
    mu = jnp.mean(x, axis=-1, keepdims=True)
    var = jnp.mean((x - mu) ** 2, axis=-1, keepdims=True)
    return (x - mu) * lax.rsqrt(var + LN_EPS) * g + b


def _gelu(x):
    # TODO(synk): BERT uses the exact erf-GELU; tanh approximation used here.
    c = math.sqrt(2.0 / math.pi)
    return 0.5 * x * (1.0 + jnp.tanh(c * (x + 0.044715 * x * x * x)))


def hsum_fused_kernel(layer_ref, mask_ref,
                      wq_ref, bq_ref, wk_ref, bk_ref, wv_ref, bv_ref,
                      wo_ref, bo_ref, ln1g_ref, ln1b_ref,
                      wi_ref, bi_ref, wo2_ref, bo2_ref, ln2g_ref, ln2b_ref,
                      wc_ref, bc_ref,
                      logits_ref,
                      acc_ref):
    """One HSUM step per grid iteration; hidden state carried in VMEM scratch."""
    step = pl.program_id(0)

    @pl.when(step == 0)
    def _():
        acc_ref[...] = jnp.zeros_like(acc_ref)

    # output = output + layers[-i-1]            (T, H), f32
    x = acc_ref[...] + layer_ref[...]
    x_bf = x.astype(jnp.bfloat16)

    mask = mask_ref[...]                        # (T, T) additive, block-diagonal, f32
    scale = jnp.float32(1.0 / math.sqrt(HD))

    wq = wq_ref[...]; wk = wk_ref[...]; wv = wv_ref[...]; wo = wo_ref[...]
    bq = bq_ref[...]; bk = bk_ref[...]; bv = bv_ref[...]

    # Multi-head self-attention over the folded (batch*seq) axis.  Per-head weight
    # slices come pre-split from the wrapper (no in-kernel lane slicing); the output
    # projection is accumulated per head (no concatenate).
    attn = jnp.zeros((T, H), jnp.float32)
    for h in range(NH):                         # static unroll over heads
        qh = jnp.dot(x_bf, wq[h], preferred_element_type=jnp.float32) + bq[h]
        kh = jnp.dot(x_bf, wk[h], preferred_element_type=jnp.float32) + bk[h]
        vh = jnp.dot(x_bf, wv[h], preferred_element_type=jnp.float32) + bv[h]

        s = jnp.dot(qh, kh.T, preferred_element_type=jnp.float32) * scale + mask
        s = s - jnp.max(s, axis=-1, keepdims=True)
        p = jnp.exp(s)
        p = p * pl.reciprocal(jnp.sum(p, axis=-1, keepdims=True), approx=True)

        ctx = jnp.dot(p.astype(jnp.bfloat16), vh.astype(jnp.bfloat16),
                      preferred_element_type=jnp.float32)
        attn = attn + jnp.dot(ctx.astype(jnp.bfloat16), wo[h],
                              preferred_element_type=jnp.float32)

    attn = attn + bo_ref[...]
    y = _layernorm(attn + x, ln1g_ref[...], ln1b_ref[...])      # BertSelfOutput

    h1 = _gelu(jnp.dot(y.astype(jnp.bfloat16), wi_ref[...],
                       preferred_element_type=jnp.float32) + bi_ref[...])
    ffn = jnp.dot(h1.astype(jnp.bfloat16), wo2_ref[...],
                  preferred_element_type=jnp.float32) + bo2_ref[...]
    out = _layernorm(ffn + y, ln2g_ref[...], ln2b_ref[...])     # BertOutput

    acc_ref[...] = out                                          # carry to next step
    logits_ref[...] = (jnp.dot(out.astype(jnp.bfloat16), wc_ref[...],
                               preferred_element_type=jnp.float32) + bc_ref[...])


def _stacked_spec(shape):
    n = len(shape)
    return pl.BlockSpec((None,) + tuple(shape[1:]),
                        lambda i, _n=n: (i,) + (0,) * (_n - 1))


def _shared_spec(shape):
    n = len(shape)
    return pl.BlockSpec(tuple(shape), lambda i, _n=n: (0,) * _n)


def hsum_layers_fused(layers, mask_add, params):
    """All COUNT HSUM steps (residual add + BertLayer + classifier) in one pallas_call."""
    bert = params["bert"]
    bf = jnp.bfloat16

    # layers[-i-1] for i = 0..COUNT-1  ==  reversed(layers); fold batch into rows.
    layers_rev = jnp.stack(layers[::-1]).reshape(COUNT, T, H)

    # Block-diagonal additive attention mask over the folded (batch*seq) axis:
    # same-batch entries use the BERT key-padding mask, cross-batch entries are
    # hard-masked so folding B never mixes batch elements.
    key_add = mask_add.reshape(T)                        # additive value per key
    bids = jnp.repeat(jnp.arange(B), S)
    big_mask = jnp.where(bids[:, None] == bids[None, :],
                         key_add[None, :], jnp.float32(-1e9)).astype(jnp.float32)

    def stack(key):
        return jnp.stack([lp[key] for lp in bert])

    # per-head weight/bias slices, prepared once outside the kernel
    wq_h = stack("wq").reshape(COUNT, H, NH, HD).transpose(0, 2, 1, 3).astype(bf)
    wk_h = stack("wk").reshape(COUNT, H, NH, HD).transpose(0, 2, 1, 3).astype(bf)
    wv_h = stack("wv").reshape(COUNT, H, NH, HD).transpose(0, 2, 1, 3).astype(bf)
    bq_h = stack("bq").reshape(COUNT, 1, NH, HD).transpose(0, 2, 1, 3)
    bk_h = stack("bk").reshape(COUNT, 1, NH, HD).transpose(0, 2, 1, 3)
    bv_h = stack("bv").reshape(COUNT, 1, NH, HD).transpose(0, 2, 1, 3)
    wo_h = stack("wo").reshape(COUNT, NH, HD, H).astype(bf)
    bo = stack("bo")
    ln1g, ln1b = stack("ln1g"), stack("ln1b")
    wi, bi = stack("wi").astype(bf), stack("bi")
    wo2, bo2 = stack("wo2").astype(bf), stack("bo2")
    ln2g, ln2b = stack("ln2g"), stack("ln2b")

    # lane-dense classifier output: pad L -> LPAD, slice back after the kernel
    wc_pad = jnp.zeros((H, LPAD), jnp.float32).at[:, :L].set(params["wc"]).astype(bf)
    bc_pad = jnp.zeros((1, LPAD), jnp.float32).at[:, :L].set(params["bc"])

    stacked = [wq_h, bq_h, wk_h, bk_h, wv_h, bv_h, wo_h, bo,
               ln1g, ln1b, wi, bi, wo2, bo2, ln2g, ln2b]

    in_specs = ([_stacked_spec(layers_rev.shape), _shared_spec(big_mask.shape)]
                + [_stacked_spec(w.shape) for w in stacked]
                + [_shared_spec(wc_pad.shape), _shared_spec(bc_pad.shape)])

    logits = pl.pallas_call(
        hsum_fused_kernel,
        grid=(COUNT,),
        in_specs=in_specs,
        out_specs=pl.BlockSpec((None, T, LPAD), lambda i: (i, 0, 0)),
        out_shape=jax.ShapeDtypeStruct((COUNT, T, LPAD), jnp.float32),
        scratch_shapes=[pltpu.VMEM((T, H), jnp.float32)],
        compiler_params=pltpu.CompilerParams(
            dimension_semantics=("arbitrary",)),   # COUNT axis carries the hidden state
    )(layers_rev, big_mask, *stacked, wc_pad, bc_pad)

    return logits[:, :, :L].reshape(COUNT, B, S, L)


# ----------------------------- CRF (plain JAX) -------------------------------
# TODO(synk): CRF forward-algorithm is a sequential scan over tiny (L,L) tensors;
# kept in plain JAX (lax.scan) under the same jit rather than a Pallas kernel.
def crf_log_likelihood_sum(emissions, tags, start, end, trans):
    """emissions: (Tseq, Bc, L) seq-first; tags: (Tseq, Bc) int32. torchcrf-style
    log-likelihood, summed over the batch (no mask)."""
    Tseq, Bc, _ = emissions.shape
    bidx = jnp.arange(Bc)

    # gold-path score
    score0 = start[tags[0]] + emissions[0, bidx, tags[0]]

    def num_body(carry, xs):
        score, prev = carry
        em_t, tag_t = xs
        score = score + trans[prev, tag_t] + em_t[bidx, tag_t]
        return (score, tag_t), None

    (score, last_tag), _ = lax.scan(num_body, (score0, tags[0]),
                                    (emissions[1:], tags[1:]))
    score = score + end[last_tag]

    # log partition function
    alpha0 = start[None, :] + emissions[0]                 # (Bc, L)

    def den_body(alpha, em_t):
        nxt = alpha[:, :, None] + trans[None, :, :] + em_t[:, None, :]
        return jax.nn.logsumexp(nxt, axis=1), None

    alpha, _ = lax.scan(den_body, alpha0, emissions[1:])
    log_z = jax.nn.logsumexp(alpha + end[None, :], axis=1)
    return jnp.sum(score - log_z)


# ----------------------------- HSUM forward ----------------------------------
def hsum_forward(layers, mask_add, labels, params):
    logits_all = hsum_layers_fused(layers, mask_add, params)   # (COUNT, B, S, L)
    losses = []
    for i in range(COUNT):
        # reproduce logits.view(S, -1, L) / labels.view(S, -1) view semantics
        em = jnp.reshape(logits_all[i], (S, -1, L))
        tg = jnp.reshape(labels, (S, -1))
        start, end, trans = params["crf"][i]
        losses.append(crf_log_likelihood_sum(em, tg, start, end, trans))
    total_loss = jnp.sum(jnp.stack(losses), axis=0)
    avg_logits = jnp.sum(logits_all, axis=0) / COUNT
    return (-total_loss, avg_logits)


# ----------------------------- params & main ---------------------------------
def init_params(key):
    def nxt():
        nonlocal key
        key, sub = jax.random.split(key)
        return sub

    def dense(shape):
        return (jax.random.normal(nxt(), shape, jnp.float32) * 0.02)

    bert = []
    for _ in range(COUNT):
        bert.append(dict(
            wq=dense((H, H)), bq=jnp.zeros((1, H), jnp.float32),
            wk=dense((H, H)), bk=jnp.zeros((1, H), jnp.float32),
            wv=dense((H, H)), bv=jnp.zeros((1, H), jnp.float32),
            wo=dense((H, H)), bo=jnp.zeros((1, H), jnp.float32),
            ln1g=jnp.ones((1, H), jnp.float32), ln1b=jnp.zeros((1, H), jnp.float32),
            wi=dense((H, I)), bi=jnp.zeros((1, I), jnp.float32),
            wo2=dense((I, H)), bo2=jnp.zeros((1, H), jnp.float32),
            ln2g=jnp.ones((1, H), jnp.float32), ln2b=jnp.zeros((1, H), jnp.float32),
        ))
    crf = []
    for _ in range(COUNT):
        crf.append((jax.random.uniform(nxt(), (L,), jnp.float32, -0.1, 0.1),     # start
                    jax.random.uniform(nxt(), (L,), jnp.float32, -0.1, 0.1),     # end
                    jax.random.uniform(nxt(), (L, L), jnp.float32, -0.1, 0.1)))  # trans
    return dict(bert=bert, crf=crf, wc=dense((H, L)), bc=jnp.zeros((1, L), jnp.float32))


if __name__ == "__main__":
    root = jax.random.PRNGKey(0)
    kp, kx, kl = jax.random.split(root, 3)
    params = init_params(kp)

    layer_keys = jax.random.split(kx, COUNT)
    layers = [jax.random.normal(k, (B, S, H), jnp.float32) for k in layer_keys]

    attn_mask = jnp.ones((B, S), jnp.float32).at[1, -2:].set(0.0)   # binary mask
    mask_add = ((1.0 - attn_mask) * -10000.0).reshape(B, 1, S)      # additive mask

    labels = jax.random.randint(kl, (B, S), 0, L, dtype=jnp.int32)

    fwd = jax.jit(hsum_forward)
    neg_total_loss, avg_logits = fwd(layers, mask_add, labels, params)
    jax.block_until_ready((neg_total_loss, avg_logits))

    assert avg_logits.shape == (B, S, L)
    assert neg_total_loss.shape == ()
    print("KERNEL_OK")
</pallas_src>

<mosaic_0001>
module attributes {stable_mosaic.version = 11 : i64} {
  func.func @hsum_fused_kernel(%arg0: i32, %arg1: memref<1x16x32xf32, #tpu.memory_space<vmem>>, %arg2: memref<16x16xf32, #tpu.memory_space<vmem>>, %arg3: memref<1x4x32x8xbf16, #tpu.memory_space<vmem>>, %arg4: memref<1x4x1x8xf32, #tpu.memory_space<vmem>>, %arg5: memref<1x4x32x8xbf16, #tpu.memory_space<vmem>>, %arg6: memref<1x4x1x8xf32, #tpu.memory_space<vmem>>, %arg7: memref<1x4x32x8xbf16, #tpu.memory_space<vmem>>, %arg8: memref<1x4x1x8xf32, #tpu.memory_space<vmem>>, %arg9: memref<1x4x8x32xbf16, #tpu.memory_space<vmem>>, %arg10: memref<1x1x32xf32, #tpu.memory_space<vmem>>, %arg11: memref<1x1x32xf32, #tpu.memory_space<vmem>>, %arg12: memref<1x1x32xf32, #tpu.memory_space<vmem>>, %arg13: memref<1x32x64xbf16, #tpu.memory_space<vmem>>, %arg14: memref<1x1x64xf32, #tpu.memory_space<vmem>>, %arg15: memref<1x64x32xbf16, #tpu.memory_space<vmem>>, %arg16: memref<1x1x32xf32, #tpu.memory_space<vmem>>, %arg17: memref<1x1x32xf32, #tpu.memory_space<vmem>>, %arg18: memref<1x1x32xf32, #tpu.memory_space<vmem>>, %arg19: memref<32x128xbf16, #tpu.memory_space<vmem>>, %arg20: memref<1x128xf32, #tpu.memory_space<vmem>>, %arg21: memref<1x16x128xf32, #tpu.memory_space<vmem>>, %arg22: memref<16x32xf32, #tpu.memory_space<vmem>>) attributes {dimension_semantics = [#tpu.dimension_semantics<arbitrary>], iteration_bounds = array<i64: 3>, scalar_prefetch = 0 : i64, scratch_operands = 1 : i64, tpu.core_type = #tpu.core_type<tc>, window_params = [{transform_indices = @transform_0, window_bounds = array<i64: 1, 16, 32>}, {pipeline_mode = #tpu.pipeline_mode<synchronous>, transform_indices = @transform_1, window_bounds = array<i64: 16, 16>}, {transform_indices = @transform_2, window_bounds = array<i64: 1, 4, 32, 8>}, {transform_indices = @transform_3, window_bounds = array<i64: 1, 4, 1, 8>}, {transform_indices = @transform_4, window_bounds = array<i64: 1, 4, 32, 8>}, {transform_indices = @transform_5, window_bounds = array<i64: 1, 4, 1, 8>}, {transform_indices = @transform_6, window_bounds = array<i64: 1, 4, 32, 8>}, {transform_indices = @transform_7, window_bounds = array<i64: 1, 4, 1, 8>}, {transform_indices = @transform_8, window_bounds = array<i64: 1, 4, 8, 32>}, {transform_indices = @transform_9, window_bounds = array<i64: 1, 1, 32>}, {transform_indices = @transform_10, window_bounds = array<i64: 1, 1, 32>}, {transform_indices = @transform_11, window_bounds = array<i64: 1, 1, 32>}, {transform_indices = @transform_12, window_bounds = array<i64: 1, 32, 64>}, {transform_indices = @transform_13, window_bounds = array<i64: 1, 1, 64>}, {transform_indices = @transform_14, window_bounds = array<i64: 1, 64, 32>}, {transform_indices = @transform_15, window_bounds = array<i64: 1, 1, 32>}, {transform_indices = @transform_16, window_bounds = array<i64: 1, 1, 32>}, {transform_indices = @transform_17, window_bounds = array<i64: 1, 1, 32>}, {pipeline_mode = #tpu.pipeline_mode<synchronous>, transform_indices = @transform_18, window_bounds = array<i64: 32, 128>}, {pipeline_mode = #tpu.pipeline_mode<synchronous>, transform_indices = @transform_19, window_bounds = array<i64: 1, 128>}, {transform_indices = @transform_20, window_bounds = array<i64: 1, 16, 128>}]} {
    %c0_i32 = arith.constant 0 : i32
    %0 = arith.cmpi eq, %arg0, %c0_i32 : i32
    %1 = arith.extui %0 : i1 to i32
    %c0_i32_0 = arith.constant 0 : i32
    %2 = arith.cmpi ne, %1, %c0_i32_0 : i32
    scf.if %2 {
      %cst_124 = arith.constant 0.000000e+00 : f32
      %297 = vector.broadcast %cst_124 : f32 to vector<16x32xf32>
      %c0_125 = arith.constant 0 : index
      %c0_126 = arith.constant 0 : index
      %298 = vector.load %arg22[%c0_125, %c0_126] : memref<16x32xf32, #tpu.memory_space<vmem>>, vector<16x32xf32>
      tpu.vector_store %arg22[%c0_125, %c0_126], %297 {strides = array<i32>} : memref<16x32xf32, #tpu.memory_space<vmem>>, vector<16x32xf32>,
    } else {
    }
    %c0 = arith.constant 0 : index
    %c0_1 = arith.constant 0 : index
    %3 = vector.load %arg22[%c0, %c0_1] : memref<16x32xf32, #tpu.memory_space<vmem>>, vector<16x32xf32>
    %c0_2 = arith.constant 0 : index
    %c0_3 = arith.constant 0 : index
    %c0_4 = arith.constant 0 : index
    %4 = vector.load %arg1[%c0_2, %c0_3, %c0_4] : memref<1x16x32xf32, #tpu.memory_space<vmem>>, vector<1x16x32xf32>
    %5 = vector.shape_cast %4 : vector<1x16x32xf32> to vector<16x32xf32>
    %6 = arith.addf %3, %5 : vector<16x32xf32>
    %7 = arith.truncf %6 : vector<16x32xf32> to vector<16x32xbf16>
    %c0_5 = arith.constant 0 : index
    %c0_6 = arith.constant 0 : index
    %8 = vector.load %arg2[%c0_5, %c0_6] : memref<16x16xf32, #tpu.memory_space<vmem>>, vector<16x16xf32>
    %c0_7 = arith.constant 0 : index
    %c0_8 = arith.constant 0 : index
    %c0_9 = arith.constant 0 : index
    %c0_10 = arith.constant 0 : index
    %9 = vector.load %arg3[%c0_7, %c0_8, %c0_9, %c0_10] : memref<1x4x32x8xbf16, #tpu.memory_space<vmem>>, vector<1x4x32x8xbf16>
    %10 = vector.shape_cast %9 : vector<1x4x32x8xbf16> to vector<4x32x8xbf16>
    %c0_11 = arith.constant 0 : index
    %c0_12 = arith.constant 0 : index
    %c0_13 = arith.constant 0 : index
    %c0_14 = arith.constant 0 : index
    %11 = vector.load %arg5[%c0_11, %c0_12, %c0_13, %c0_14] : memref<1x4x32x8xbf16, #tpu.memory_space<vmem>>, vector<1x4x32x8xbf16>
    %12 = vector.shape_cast %11 : vector<1x4x32x8xbf16> to vector<4x32x8xbf16>
    %c0_15 = arith.constant 0 : index
    %c0_16 = arith.constant 0 : index
    %c0_17 = arith.constant 0 : index
    %c0_18 = arith.constant 0 : index
    %13 = vector.load %arg7[%c0_15, %c0_16, %c0_17, %c0_18] : memref<1x4x32x8xbf16, #tpu.memory_space<vmem>>, vector<1x4x32x8xbf16>
    %14 = vector.shape_cast %13 : vector<1x4x32x8xbf16> to vector<4x32x8xbf16>
    %c0_19 = arith.constant 0 : index
    %c0_20 = arith.constant 0 : index
    %c0_21 = arith.constant 0 : index
    %c0_22 = arith.constant 0 : index
    %15 = vector.load %arg9[%c0_19, %c0_20, %c0_21, %c0_22] : memref<1x4x8x32xbf16, #tpu.memory_space<vmem>>, vector<1x4x8x32xbf16>
    %16 = vector.shape_cast %15 : vector<1x4x8x32xbf16> to vector<4x8x32xbf16>
    %c0_23 = arith.constant 0 : index
    %c0_24 = arith.constant 0 : index
    %c0_25 = arith.constant 0 : index
    %c0_26 = arith.constant 0 : index
    %17 = vector.load %arg4[%c0_23, %c0_24, %c0_25, %c0_26] : memref<1x4x1x8xf32, #tpu.memory_space<vmem>>, vector<1x4x1x8xf32>
    %18 = vector.shape_cast %17 : vector<1x4x1x8xf32> to vector<4x1x8xf32>
    %c0_27 = arith.constant 0 : index
    %c0_28 = arith.constant 0 : index
    %c0_29 = arith.constant 0 : index
    %c0_30 = arith.constant 0 : index
    %19 = vector.load %arg6[%c0_27, %c0_28, %c0_29, %c0_30] : memref<1x4x1x8xf32, #tpu.memory_space<vmem>>, vector<1x4x1x8xf32>
    %20 = vector.shape_cast %19 : vector<1x4x1x8xf32> to vector<4x1x8xf32>
    %c0_31 = arith.constant 0 : index
    %c0_32 = arith.constant 0 : index
    %c0_33 = arith.constant 0 : index
    %c0_34 = arith.constant 0 : index
    %21 = vector.load %arg8[%c0_31, %c0_32, %c0_33, %c0_34] : memref<1x4x1x8xf32, #tpu.memory_space<vmem>>, vector<1x4x1x8xf32>
    %22 = vector.shape_cast %21 : vector<1x4x1x8xf32> to vector<4x1x8xf32>
    %cst = arith.constant 0.000000e+00 : f32
    %23 = vector.broadcast %cst : f32 to vector<16x32xf32>
    %24 = vector.extract_strided_slice %10 {offsets = [0, 0, 0], sizes = [1, 32, 8], strides = [1, 1, 1]} : vector<4x32x8xbf16> to vector<1x32x8xbf16>
    %25 = vector.shape_cast %24 : vector<1x32x8xbf16> to vector<32x8xbf16>
    %cst_35 = arith.constant dense<0.000000e+00> : vector<16x8xf32>
    %26 = tpu.matmul %7, %25, %cst_35 {dimension_numbers = #tpu.dot_dimension_numbers<[1], [0], [0], [1], [0, 0, 1, 1], [], []>} : vector<16x32xbf16>, vector<32x8xbf16>, vector<16x8xf32> -> vector<16x8xf32>
    %27 = vector.extract_strided_slice %18 {offsets = [0, 0, 0], sizes = [1, 1, 8], strides = [1, 1, 1]} : vector<4x1x8xf32> to vector<1x1x8xf32>
    %28 = vector.shape_cast %27 : vector<1x1x8xf32> to vector<1x8xf32>
    %29 = vector.broadcast %28 : vector<1x8xf32> to vector<16x8xf32>
    %30 = arith.addf %26, %29 : vector<16x8xf32>
    %31 = vector.extract_strided_slice %12 {offsets = [0, 0, 0], sizes = [1, 32, 8], strides = [1, 1, 1]} : vector<4x32x8xbf16> to vector<1x32x8xbf16>
    %32 = vector.shape_cast %31 : vector<1x32x8xbf16> to vector<32x8xbf16>
    %cst_36 = arith.constant dense<0.000000e+00> : vector<16x8xf32>
    %33 = tpu.matmul %7, %32, %cst_36 {dimension_numbers = #tpu.dot_dimension_numbers<[1], [0], [0], [1], [0, 0, 1, 1], [], []>} : vector<16x32xbf16>, vector<32x8xbf16>, vector<16x8xf32> -> vector<16x8xf32>
    %34 = vector.extract_strided_slice %20 {offsets = [0, 0, 0], sizes = [1, 1, 8], strides = [1, 1, 1]} : vector<4x1x8xf32> to vector<1x1x8xf32>
    %35 = vector.shape_cast %34 : vector<1x1x8xf32> to vector<1x8xf32>
    %36 = vector.broadcast %35 : vector<1x8xf32> to vector<16x8xf32>
    %37 = arith.addf %33, %36 : vector<16x8xf32>
    %38 = vector.extract_strided_slice %14 {offsets = [0, 0, 0], sizes = [1, 32, 8], strides = [1, 1, 1]} : vector<4x32x8xbf16> to vector<1x32x8xbf16>
    %39 = vector.shape_cast %38 : vector<1x32x8xbf16> to vector<32x8xbf16>
    %cst_37 = arith.constant dense<0.000000e+00> : vector<16x8xf32>
    %40 = tpu.matmul %7, %39, %cst_37 {dimension_numbers = #tpu.dot_dimension_numbers<[1], [0], [0], [1], [0, 0, 1, 1], [], []>} : vector<16x32xbf16>, vector<32x8xbf16>, vector<16x8xf32> -> vector<16x8xf32>
    %41 = vector.extract_strided_slice %22 {offsets = [0, 0, 0], sizes = [1, 1, 8], strides = [1, 1, 1]} : vector<4x1x8xf32> to vector<1x1x8xf32>
    %42 = vector.shape_cast %41 : vector<1x1x8xf32> to vector<1x8xf32>
    %43 = vector.broadcast %42 : vector<1x8xf32> to vector<16x8xf32>
    %44 = arith.addf %40, %43 : vector<16x8xf32>
    %45 = tpu.transpose %37, [1, 0] : vector<16x8xf32> -> vector<8x16xf32>
    %cst_38 = arith.constant dense<0.000000e+00> : vector<16x16xf32>
    %46 = tpu.matmul %30, %45, %cst_38 {dimension_numbers = #tpu.dot_dimension_numbers<[1], [0], [0], [1], [0, 0, 1, 1], [], []>} : vector<16x8xf32>, vector<8x16xf32>, vector<16x16xf32> -> vector<16x16xf32>
    %cst_39 = arith.constant 0.353553385 : f32
    %47 = vector.broadcast %cst_39 : f32 to vector<16x16xf32>
    %48 = arith.mulf %46, %47 : vector<16x16xf32>
    %49 = arith.addf %48, %8 : vector<16x16xf32>
    %cst_40 = arith.constant dense<0xFF800000> : vector<16xf32>
    %50 = vector.multi_reduction <maximumf>, %49, %cst_40 [1] : vector<16x16xf32> to vector<16xf32>
    %51 = vector.shape_cast %50 : vector<16xf32> to vector<16x1xf32>
    %52 = vector.broadcast %51 : vector<16x1xf32> to vector<16x16xf32>
    %53 = arith.subf %49, %52 : vector<16x16xf32>
    %54 = math.exp %53 : vector<16x16xf32>
    %cst_41 = arith.constant dense<0.000000e+00> : vector<16xf32>
    %55 = vector.multi_reduction <add>, %54, %cst_41 [1] : vector<16x16xf32> to vector<16xf32>
    %56 = vector.shape_cast %55 : vector<16xf32> to vector<16x1xf32>
    %57 = tpu.reciprocal %56 {approx = true} : vector<16x1xf32> -> vector<16x1xf32>
    %58 = vector.broadcast %57 : vector<16x1xf32> to vector<16x16xf32>
    %59 = arith.mulf %54, %58 : vector<16x16xf32>
    %60 = arith.truncf %59 : vector<16x16xf32> to vector<16x16xbf16>
    %61 = arith.truncf %44 : vector<16x8xf32> to vector<16x8xbf16>
    %cst_42 = arith.constant dense<0.000000e+00> : vector<16x8xf32>
    %62 = tpu.matmul %60, %61, %cst_42 {dimension_numbers = #tpu.dot_dimension_numbers<[1], [0], [0], [1], [0, 0, 1, 1], [], []>} : vector<16x16xbf16>, vector<16x8xbf16>, vector<16x8xf32> -> vector<16x8xf32>
    %63 = arith.truncf %62 : vector<16x8xf32> to vector<16x8xbf16>
    %64 = vector.extract_strided_slice %16 {offsets = [0, 0, 0], sizes = [1, 8, 32], strides = [1, 1, 1]} : vector<4x8x32xbf16> to vector<1x8x32xbf16>
    %65 = vector.shape_cast %64 : vector<1x8x32xbf16> to vector<8x32xbf16>
    %cst_43 = arith.constant dense<0.000000e+00> : vector<16x32xf32>
    %66 = tpu.matmul %63, %65, %cst_43 {dimension_numbers = #tpu.dot_dimension_numbers<[1], [0], [0], [1], [0, 0, 1, 1], [], []>} : vector<16x8xbf16>, vector<8x32xbf16>, vector<16x32xf32> -> vector<16x32xf32>
    %67 = arith.addf %23, %66 : vector<16x32xf32>
    %68 = vector.extract_strided_slice %10 {offsets = [1, 0, 0], sizes = [1, 32, 8], strides = [1, 1, 1]} : vector<4x32x8xbf16> to vector<1x32x8xbf16>
    %69 = vector.shape_cast %68 : vector<1x32x8xbf16> to vector<32x8xbf16>
    %cst_44 = arith.constant dense<0.000000e+00> : vector<16x8xf32>
    %70 = tpu.matmul %7, %69, %cst_44 {dimension_numbers = #tpu.dot_dimension_numbers<[1], [0], [0], [1], [0, 0, 1, 1], [], []>} : vector<16x32xbf16>, vector<32x8xbf16>, vector<16x8xf32> -> vector<16x8xf32>
    %71 = vector.extract_strided_slice %18 {offsets = [1, 0, 0], sizes = [1, 1, 8], strides = [1, 1, 1]} : vector<4x1x8xf32> to vector<1x1x8xf32>
    %72 = vector.shape_cast %71 : vector<1x1x8xf32> to vector<1x8xf32>
    %73 = vector.broadcast %72 : vector<1x8xf32> to vector<16x8xf32>
    %74 = arith.addf %70, %73 : vector<16x8xf32>
    %75 = vector.extract_strided_slice %12 {offsets = [1, 0, 0], sizes = [1, 32, 8], strides = [1, 1, 1]} : vector<4x32x8xbf16> to vector<1x32x8xbf16>
    %76 = vector.shape_cast %75 : vector<1x32x8xbf16> to vector<32x8xbf16>
    %cst_45 = arith.constant dense<0.000000e+00> : vector<16x8xf32>
    %77 = tpu.matmul %7, %76, %cst_45 {dimension_numbers = #tpu.dot_dimension_numbers<[1], [0], [0], [1], [0, 0, 1, 1], [], []>} : vector<16x32xbf16>, vector<32x8xbf16>, vector<16x8xf32> -> vector<16x8xf32>
    %78 = vector.extract_strided_slice %20 {offsets = [1, 0, 0], sizes = [1, 1, 8], strides = [1, 1, 1]} : vector<4x1x8xf32> to vector<1x1x8xf32>
    %79 = vector.shape_cast %78 : vector<1x1x8xf32> to vector<1x8xf32>
    %80 = vector.broadcast %79 : vector<1x8xf32> to vector<16x8xf32>
    %81 = arith.addf %77, %80 : vector<16x8xf32>
    %82 = vector.extract_strided_slice %14 {offsets = [1, 0, 0], sizes = [1, 32, 8], strides = [1, 1, 1]} : vector<4x32x8xbf16> to vector<1x32x8xbf16>
    %83 = vector.shape_cast %82 : vector<1x32x8xbf16> to vector<32x8xbf16>
    %cst_46 = arith.constant dense<0.000000e+00> : vector<16x8xf32>
    %84 = tpu.matmul %7, %83, %cst_46 {dimension_numbers = #tpu.dot_dimension_numbers<[1], [0], [0], [1], [0, 0, 1, 1], [], []>} : vector<16x32xbf16>, vector<32x8xbf16>, vector<16x8xf32> -> vector<16x8xf32>
    %85 = vector.extract_strided_slice %22 {offsets = [1, 0, 0], sizes = [1, 1, 8], strides = [1, 1, 1]} : vector<4x1x8xf32> to vector<1x1x8xf32>
    %86 = vector.shape_cast %85 : vector<1x1x8xf32> to vector<1x8xf32>
    %87 = vector.broadcast %86 : vector<1x8xf32> to vector<16x8xf32>
    %88 = arith.addf %84, %87 : vector<16x8xf32>
    %89 = tpu.transpose %81, [1, 0] : vector<16x8xf32> -> vector<8x16xf32>
    %cst_47 = arith.constant dense<0.000000e+00> : vector<16x16xf32>
    %90 = tpu.matmul %74, %89, %cst_47 {dimension_numbers = #tpu.dot_dimension_numbers<[1], [0], [0], [1], [0, 0, 1, 1], [], []>} : vector<16x8xf32>, vector<8x16xf32>, vector<16x16xf32> -> vector<16x16xf32>
    %cst_48 = arith.constant 0.353553385 : f32
    %91 = vector.broadcast %cst_48 : f32 to vector<16x16xf32>
    %92 = arith.mulf %90, %91 : vector<16x16xf32>
    %93 = arith.addf %92, %8 : vector<16x16xf32>
    %cst_49 = arith.constant dense<0xFF800000> : vector<16xf32>
    %94 = vector.multi_reduction <maximumf>, %93, %cst_49 [1] : vector<16x16xf32> to vector<16xf32>
    %95 = vector.shape_cast %94 : vector<16xf32> to vector<16x1xf32>
    %96 = vector.broadcast %95 : vector<16x1xf32> to vector<16x16xf32>
    %97 = arith.subf %93, %96 : vector<16x16xf32>
    %98 = math.exp %97 : vector<16x16xf32>
    %cst_50 = arith.constant dense<0.000000e+00> : vector<16xf32>
    %99 = vector.multi_reduction <add>, %98, %cst_50 [1] : vector<16x16xf32> to vector<16xf32>
    %100 = vector.shape_cast %99 : vector<16xf32> to vector<16x1xf32>
    %101 = tpu.reciprocal %100 {approx = true} : vector<16x1xf32> -> vector<16x1xf32>
    %102 = vector.broadcast %101 : vector<16x1xf32> to vector<16x16xf32>
    %103 = arith.mulf %98, %102 : vector<16x16xf32>
    %104 = arith.truncf %103 : vector<16x16xf32> to vector<16x16xbf16>
    %105 = arith.truncf %88 : vector<16x8xf32> to vector<16x8xbf16>
    %cst_51 = arith.constant dense<0.000000e+00> : vector<16x8xf32>
    %106 = tpu.matmul %104, %105, %cst_51 {dimension_numbers = #tpu.dot_dimension_numbers<[1], [0], [0], [1], [0, 0, 1, 1], [], []>} : vector<16x16xbf16>, vector<16x8xbf16>, vector<16x8xf32> -> vector<16x8xf32>
    %107 = arith.truncf %106 : vector<16x8xf32> to vector<16x8xbf16>
    %108 = vector.extract_strided_slice %16 {offsets = [1, 0, 0], sizes = [1, 8, 32], strides = [1, 1, 1]} : vector<4x8x32xbf16> to vector<1x8x32xbf16>
    %109 = vector.shape_cast %108 : vector<1x8x32xbf16> to vector<8x32xbf16>
    %cst_52 = arith.constant dense<0.000000e+00> : vector<16x32xf32>
    %110 = tpu.matmul %107, %109, %cst_52 {dimension_numbers = #tpu.dot_dimension_numbers<[1], [0], [0], [1], [0, 0, 1, 1], [], []>} : vector<16x8xbf16>, vector<8x32xbf16>, vector<16x32xf32> -> vector<16x32xf32>
    %111 = arith.addf %67, %110 : vector<16x32xf32>
    %112 = vector.extract_strided_slice %10 {offsets = [2, 0, 0], sizes = [1, 32, 8], strides = [1, 1, 1]} : vector<4x32x8xbf16> to vector<1x32x8xbf16>
    %113 = vector.shape_cast %112 : vector<1x32x8xbf16> to vector<32x8xbf16>
    %cst_53 = arith.constant dense<0.000000e+00> : vector<16x8xf32>
    %114 = tpu.matmul %7, %113, %cst_53 {dimension_numbers = #tpu.dot_dimension_numbers<[1], [0], [0], [1], [0, 0, 1, 1], [], []>} : vector<16x32xbf16>, vector<32x8xbf16>, vector<16x8xf32> -> vector<16x8xf32>
    %115 = vector.extract_strided_slice %18 {offsets = [2, 0, 0], sizes = [1, 1, 8], strides = [1, 1, 1]} : vector<4x1x8xf32> to vector<1x1x8xf32>
    %116 = vector.shape_cast %115 : vector<1x1x8xf32> to vector<1x8xf32>
    %117 = vector.broadcast %116 : vector<1x8xf32> to vector<16x8xf32>
    %118 = arith.addf %114, %117 : vector<16x8xf32>
    %119 = vector.extract_strided_slice %12 {offsets = [2, 0, 0], sizes = [1, 32, 8], strides = [1, 1, 1]} : vector<4x32x8xbf16> to vector<1x32x8xbf16>
    %120 = vector.shape_cast %119 : vector<1x32x8xbf16> to vector<32x8xbf16>
    %cst_54 = arith.constant dense<0.000000e+00> : vector<16x8xf32>
    %121 = tpu.matmul %7, %120, %cst_54 {dimension_numbers = #tpu.dot_dimension_numbers<[1], [0], [0], [1], [0, 0, 1, 1], [], []>} : vector<16x32xbf16>, vector<32x8xbf16>, vector<16x8xf32> -> vector<16x8xf32>
    %122 = vector.extract_strided_slice %20 {offsets = [2, 0, 0], sizes = [1, 1, 8], strides = [1, 1, 1]} : vector<4x1x8xf32> to vector<1x1x8xf32>
    %123 = vector.shape_cast %122 : vector<1x1x8xf32> to vector<1x8xf32>
    %124 = vector.broadcast %123 : vector<1x8xf32> to vector<16x8xf32>
    %125 = arith.addf %121, %124 : vector<16x8xf32>
    %126 = vector.extract_strided_slice %14 {offsets = [2, 0, 0], sizes = [1, 32, 8], strides = [1, 1, 1]} : vector<4x32x8xbf16> to vector<1x32x8xbf16>
    %127 = vector.shape_cast %126 : vector<1x32x8xbf16> to vector<32x8xbf16>
    %cst_55 = arith.constant dense<0.000000e+00> : vector<16x8xf32>
    %128 = tpu.matmul %7, %127, %cst_55 {dimension_numbers = #tpu.dot_dimension_numbers<[1], [0], [0], [1], [0, 0, 1, 1], [], []>} : vector<16x32xbf16>, vector<32x8xbf16>, vector<16x8xf32> -> vector<16x8xf32>
    %129 = vector.extract_strided_slice %22 {offsets = [2, 0, 0], sizes = [1, 1, 8], strides = [1, 1, 1]} : vector<4x1x8xf32> to vector<1x1x8xf32>
    %130 = vector.shape_cast %129 : vector<1x1x8xf32> to vector<1x8xf32>
    %131 = vector.broadcast %130 : vector<1x8xf32> to vector<16x8xf32>
    %132 = arith.addf %128, %131 : vector<16x8xf32>
    %133 = tpu.transpose %125, [1, 0] : vector<16x8xf32> -> vector<8x16xf32>
    %cst_56 = arith.constant dense<0.000000e+00> : vector<16x16xf32>
    %134 = tpu.matmul %118, %133, %cst_56 {dimension_numbers = #tpu.dot_dimension_numbers<[1], [0], [0], [1], [0, 0, 1, 1], [], []>} : vector<16x8xf32>, vector<8x16xf32>, vector<16x16xf32> -> vector<16x16xf32>
    %cst_57 = arith.constant 0.353553385 : f32
    %135 = vector.broadcast %cst_57 : f32 to vector<16x16xf32>
    %136 = arith.mulf %134, %135 : vector<16x16xf32>
    %137 = arith.addf %136, %8 : vector<16x16xf32>
    %cst_58 = arith.constant dense<0xFF800000> : vector<16xf32>
    %138 = vector.multi_reduction <maximumf>, %137, %cst_58 [1] : vector<16x16xf32> to vector<16xf32>
    %139 = vector.shape_cast %138 : vector<16xf32> to vector<16x1xf32>
    %140 = vector.broadcast %139 : vector<16x1xf32> to vector<16x16xf32>
    %141 = arith.subf %137, %140 : vector<16x16xf32>
    %142 = math.exp %141 : vector<16x16xf32>
    %cst_59 = arith.constant dense<0.000000e+00> : vector<16xf32>
    %143 = vector.multi_reduction <add>, %142, %cst_59 [1] : vector<16x16xf32> to vector<16xf32>
    %144 = vector.shape_cast %143 : vector<16xf32> to vector<16x1xf32>
    %145 = tpu.reciprocal %144 {approx = true} : vector<16x1xf32> -> vector<16x1xf32>
    %146 = vector.broadcast %145 : vector<16x1xf32> to vector<16x16xf32>
    %147 = arith.mulf %142, %146 : vector<16x16xf32>
    %148 = arith.truncf %147 : vector<16x16xf32> to vector<16x16xbf16>
    %149 = arith.truncf %132 : vector<16x8xf32> to vector<16x8xbf16>
    %cst_60 = arith.constant dense<0.000000e+00> : vector<16x8xf32>
    %150 = tpu.matmul %148, %149, %cst_60 {dimension_numbers = #tpu.dot_dimension_numbers<[1], [0], [0], [1], [0, 0, 1, 1], [], []>} : vector<16x16xbf16>, vector<16x8xbf16>, vector<16x8xf32> -> vector<16x8xf32>
    %151 = arith.truncf %150 : vector<16x8xf32> to vector<16x8xbf16>
    %152 = vector.extract_strided_slice %16 {offsets = [2, 0, 0], sizes = [1, 8, 32], strides = [1, 1, 1]} : vector<4x8x32xbf16> to vector<1x8x32xbf16>
    %153 = vector.shape_cast %152 : vector<1x8x32xbf16> to vector<8x32xbf16>
    %cst_61 = arith.constant dense<0.000000e+00> : vector<16x32xf32>
    %154 = tpu.matmul %151, %153, %cst_61 {dimension_numbers = #tpu.dot_dimension_numbers<[1], [0], [0], [1], [0, 0, 1, 1], [], []>} : vector<16x8xbf16>, vector<8x32xbf16>, vector<16x32xf32> -> vector<16x32xf32>
    %155 = arith.addf %111, %154 : vector<16x32xf32>
    %156 = vector.extract_strided_slice %10 {offsets = [3, 0, 0], sizes = [1, 32, 8], strides = [1, 1, 1]} : vector<4x32x8xbf16> to vector<1x32x8xbf16>
    %157 = vector.shape_cast %156 : vector<1x32x8xbf16> to vector<32x8xbf16>
    %cst_62 = arith.constant dense<0.000000e+00> : vector<16x8xf32>
    %158 = tpu.matmul %7, %157, %cst_62 {dimension_numbers = #tpu.dot_dimension_numbers<[1], [0], [0], [1], [0, 0, 1, 1], [], []>} : vector<16x32xbf16>, vector<32x8xbf16>, vector<16x8xf32> -> vector<16x8xf32>
    %159 = vector.extract_strided_slice %18 {offsets = [3, 0, 0], sizes = [1, 1, 8], strides = [1, 1, 1]} : vector<4x1x8xf32> to vector<1x1x8xf32>
    %160 = vector.shape_cast %159 : vector<1x1x8xf32> to vector<1x8xf32>
    %161 = vector.broadcast %160 : vector<1x8xf32> to vector<16x8xf32>
    %162 = arith.addf %158, %161 : vector<16x8xf32>
    %163 = vector.extract_strided_slice %12 {offsets = [3, 0, 0], sizes = [1, 32, 8], strides = [1, 1, 1]} : vector<4x32x8xbf16> to vector<1x32x8xbf16>
    %164 = vector.shape_cast %163 : vector<1x32x8xbf16> to vector<32x8xbf16>
    %cst_63 = arith.constant dense<0.000000e+00> : vector<16x8xf32>
    %165 = tpu.matmul %7, %164, %cst_63 {dimension_numbers = #tpu.dot_dimension_numbers<[1], [0], [0], [1], [0, 0, 1, 1], [], []>} : vector<16x32xbf16>, vector<32x8xbf16>, vector<16x8xf32> -> vector<16x8xf32>
    %166 = vector.extract_strided_slice %20 {offsets = [3, 0, 0], sizes = [1, 1, 8], strides = [1, 1, 1]} : vector<4x1x8xf32> to vector<1x1x8xf32>
    %167 = vector.shape_cast %166 : vector<1x1x8xf32> to vector<1x8xf32>
    %168 = vector.broadcast %167 : vector<1x8xf32> to vector<16x8xf32>
    %169 = arith.addf %165, %168 : vector<16x8xf32>
    %170 = vector.extract_strided_slice %14 {offsets = [3, 0, 0], sizes = [1, 32, 8], strides = [1, 1, 1]} : vector<4x32x8xbf16> to vector<1x32x8xbf16>
    %171 = vector.shape_cast %170 : vector<1x32x8xbf16> to vector<32x8xbf16>
    %cst_64 = arith.constant dense<0.000000e+00> : vector<16x8xf32>
    %172 = tpu.matmul %7, %171, %cst_64 {dimension_numbers = #tpu.dot_dimension_numbers<[1], [0], [0], [1], [0, 0, 1, 1], [], []>} : vector<16x32xbf16>, vector<32x8xbf16>, vector<16x8xf32> -> vector<16x8xf32>
    %173 = vector.extract_strided_slice %22 {offsets = [3, 0, 0], sizes = [1, 1, 8], strides = [1, 1, 1]} : vector<4x1x8xf32> to vector<1x1x8xf32>
    %174 = vector.shape_cast %173 : vector<1x1x8xf32> to vector<1x8xf32>
    %175 = vector.broadcast %174 : vector<1x8xf32> to vector<16x8xf32>
    %176 = arith.addf %172, %175 : vector<16x8xf32>
    %177 = tpu.transpose %169, [1, 0] : vector<16x8xf32> -> vector<8x16xf32>
    %cst_65 = arith.constant dense<0.000000e+00> : vector<16x16xf32>
    %178 = tpu.matmul %162, %177, %cst_65 {dimension_numbers = #tpu.dot_dimension_numbers<[1], [0], [0], [1], [0, 0, 1, 1], [], []>} : vector<16x8xf32>, vector<8x16xf32>, vector<16x16xf32> -> vector<16x16xf32>
    %cst_66 = arith.constant 0.353553385 : f32
    %179 = vector.broadcast %cst_66 : f32 to vector<16x16xf32>
    %180 = arith.mulf %178, %179 : vector<16x16xf32>
    %181 = arith.addf %180, %8 : vector<16x16xf32>
    %cst_67 = arith.constant dense<0xFF800000> : vector<16xf32>
    %182 = vector.multi_reduction <maximumf>, %181, %cst_67 [1] : vector<16x16xf32> to vector<16xf32>
    %183 = vector.shape_cast %182 : vector<16xf32> to vector<16x1xf32>
    %184 = vector.broadcast %183 : vector<16x1xf32> to vector<16x16xf32>
    %185 = arith.subf %181, %184 : vector<16x16xf32>
    %186 = math.exp %185 : vector<16x16xf32>
    %cst_68 = arith.constant dense<0.000000e+00> : vector<16xf32>
    %187 = vector.multi_reduction <add>, %186, %cst_68 [1] : vector<16x16xf32> to vector<16xf32>
    %188 = vector.shape_cast %187 : vector<16xf32> to vector<16x1xf32>
    %189 = tpu.reciprocal %188 {approx = true} : vector<16x1xf32> -> vector<16x1xf32>
    %190 = vector.broadcast %189 : vector<16x1xf32> to vector<16x16xf32>
    %191 = arith.mulf %186, %190 : vector<16x16xf32>
    %192 = arith.truncf %191 : vector<16x16xf32> to vector<16x16xbf16>
    %193 = arith.truncf %176 : vector<16x8xf32> to vector<16x8xbf16>
    %cst_69 = arith.constant dense<0.000000e+00> : vector<16x8xf32>
    %194 = tpu.matmul %192, %193, %cst_69 {dimension_numbers = #tpu.dot_dimension_numbers<[1], [0], [0], [1], [0, 0, 1, 1], [], []>} : vector<16x16xbf16>, vector<16x8xbf16>, vector<16x8xf32> -> vector<16x8xf32>
    %195 = arith.truncf %194 : vector<16x8xf32> to vector<16x8xbf16>
    %196 = vector.extract_strided_slice %16 {offsets = [3, 0, 0], sizes = [1, 8, 32], strides = [1, 1, 1]} : vector<4x8x32xbf16> to vector<1x8x32xbf16>
    %197 = vector.shape_cast %196 : vector<1x8x32xbf16> to vector<8x32xbf16>
    %cst_70 = arith.constant dense<0.000000e+00> : vector<16x32xf32>
    %198 = tpu.matmul %195, %197, %cst_70 {dimension_numbers = #tpu.dot_dimension_numbers<[1], [0], [0], [1], [0, 0, 1, 1], [], []>} : vector<16x8xbf16>, vector<8x32xbf16>, vector<16x32xf32> -> vector<16x32xf32>
    %199 = arith.addf %155, %198 : vector<16x32xf32>
    %c0_71 = arith.constant 0 : index
    %c0_72 = arith.constant 0 : index
    %c0_73 = arith.constant 0 : index
    %200 = vector.load %arg10[%c0_71, %c0_72, %c0_73] : memref<1x1x32xf32, #tpu.memory_space<vmem>>, vector<1x1x32xf32>
    %201 = vector.shape_cast %200 : vector<1x1x32xf32> to vector<1x32xf32>
    %202 = vector.broadcast %201 : vector<1x32xf32> to vector<16x32xf32>
    %203 = arith.addf %199, %202 : vector<16x32xf32>
    %204 = arith.addf %203, %6 : vector<16x32xf32>
    %c0_74 = arith.constant 0 : index
    %c0_75 = arith.constant 0 : index
    %c0_76 = arith.constant 0 : index
    %205 = vector.load %arg11[%c0_74, %c0_75, %c0_76] : memref<1x1x32xf32, #tpu.memory_space<vmem>>, vector<1x1x32xf32>
    %206 = vector.shape_cast %205 : vector<1x1x32xf32> to vector<1x32xf32>
    %c0_77 = arith.constant 0 : index
    %c0_78 = arith.constant 0 : index
    %c0_79 = arith.constant 0 : index
    %207 = vector.load %arg12[%c0_77, %c0_78, %c0_79] : memref<1x1x32xf32, #tpu.memory_space<vmem>>, vector<1x1x32xf32>
    %208 = vector.shape_cast %207 : vector<1x1x32xf32> to vector<1x32xf32>
    %cst_80 = arith.constant dense<0.000000e+00> : vector<16xf32>
    %209 = vector.multi_reduction <add>, %204, %cst_80 [1] : vector<16x32xf32> to vector<16xf32>
    %210 = vector.shape_cast %209 : vector<16xf32> to vector<16x1xf32>
    %cst_81 = arith.constant 3.200000e+01 : f32
    %211 = vector.broadcast %cst_81 : f32 to vector<16x1xf32>
    %212 = arith.divf %210, %211 : vector<16x1xf32>
    %213 = vector.broadcast %212 : vector<16x1xf32> to vector<16x32xf32>
    %214 = arith.subf %204, %213 : vector<16x32xf32>
    %215 = arith.mulf %214, %214 : vector<16x32xf32>
    %cst_82 = arith.constant dense<0.000000e+00> : vector<16xf32>
    %216 = vector.multi_reduction <add>, %215, %cst_82 [1] : vector<16x32xf32> to vector<16xf32>
    %217 = vector.shape_cast %216 : vector<16xf32> to vector<16x1xf32>
    %cst_83 = arith.constant 3.200000e+01 : f32
    %218 = vector.broadcast %cst_83 : f32 to vector<16x1xf32>
    %219 = arith.divf %217, %218 : vector<16x1xf32>
    %220 = vector.broadcast %212 : vector<16x1xf32> to vector<16x32xf32>
    %221 = arith.subf %204, %220 : vector<16x32xf32>
    %cst_84 = arith.constant 9.99999996E-13 : f32
    %222 = vector.broadcast %cst_84 : f32 to vector<16x1xf32>
    %223 = arith.addf %219, %222 : vector<16x1xf32>
    %224 = math.rsqrt %223 : vector<16x1xf32>
    %225 = vector.broadcast %224 : vector<16x1xf32> to vector<16x32xf32>
    %226 = arith.mulf %221, %225 : vector<16x32xf32>
    %227 = vector.broadcast %206 : vector<1x32xf32> to vector<16x32xf32>
    %228 = arith.mulf %226, %227 : vector<16x32xf32>
    %229 = vector.broadcast %208 : vector<1x32xf32> to vector<16x32xf32>
    %230 = arith.addf %228, %229 : vector<16x32xf32>
    %231 = arith.truncf %230 : vector<16x32xf32> to vector<16x32xbf16>
    %c0_85 = arith.constant 0 : index
    %c0_86 = arith.constant 0 : index
    %c0_87 = arith.constant 0 : index
    %232 = vector.load %arg13[%c0_85, %c0_86, %c0_87] : memref<1x32x64xbf16, #tpu.memory_space<vmem>>, vector<1x32x64xbf16>
    %233 = vector.shape_cast %232 : vector<1x32x64xbf16> to vector<32x64xbf16>
    %cst_88 = arith.constant dense<0.000000e+00> : vector<16x64xf32>
    %234 = tpu.matmul %231, %233, %cst_88 {dimension_numbers = #tpu.dot_dimension_numbers<[1], [0], [0], [1], [0, 0, 1, 1], [], []>} : vector<16x32xbf16>, vector<32x64xbf16>, vector<16x64xf32> -> vector<16x64xf32>
    %c0_89 = arith.constant 0 : index
    %c0_90 = arith.constant 0 : index
    %c0_91 = arith.constant 0 : index
    %235 = vector.load %arg14[%c0_89, %c0_90, %c0_91] : memref<1x1x64xf32, #tpu.memory_space<vmem>>, vector<1x1x64xf32>
    %236 = vector.shape_cast %235 : vector<1x1x64xf32> to vector<1x64xf32>
    %237 = vector.broadcast %236 : vector<1x64xf32> to vector<16x64xf32>
    %238 = arith.addf %234, %237 : vector<16x64xf32>
    %cst_92 = arith.constant 5.000000e-01 : f32
    %239 = vector.broadcast %cst_92 : f32 to vector<16x64xf32>
    %240 = arith.mulf %239, %238 : vector<16x64xf32>
    %cst_93 = arith.constant 4.471500e-02 : f32
    %241 = vector.broadcast %cst_93 : f32 to vector<16x64xf32>
    %242 = arith.mulf %241, %238 : vector<16x64xf32>
    %243 = arith.mulf %242, %238 : vector<16x64xf32>
    %244 = arith.mulf %243, %238 : vector<16x64xf32>
    %245 = arith.addf %238, %244 : vector<16x64xf32>
    %cst_94 = arith.constant 0.797884583 : f32
    %246 = vector.broadcast %cst_94 : f32 to vector<16x64xf32>
    %247 = arith.mulf %246, %245 : vector<16x64xf32>
    %248 = math.tanh %247 : vector<16x64xf32>
    %cst_95 = arith.constant 1.000000e+00 : f32
    %249 = vector.broadcast %cst_95 : f32 to vector<16x64xf32>
    %250 = arith.addf %249, %248 : vector<16x64xf32>
    %251 = arith.mulf %240, %250 : vector<16x64xf32>
    %252 = arith.truncf %251 : vector<16x64xf32> to vector<16x64xbf16>
    %c0_96 = arith.constant 0 : index
    %c0_97 = arith.constant 0 : index
    %c0_98 = arith.constant 0 : index
    %253 = vector.load %arg15[%c0_96, %c0_97, %c0_98] : memref<1x64x32xbf16, #tpu.memory_space<vmem>>, vector<1x64x32xbf16>
    %254 = vector.shape_cast %253 : vector<1x64x32xbf16> to vector<64x32xbf16>
    %cst_99 = arith.constant dense<0.000000e+00> : vector<16x32xf32>
    %255 = tpu.matmul %252, %254, %cst_99 {dimension_numbers = #tpu.dot_dimension_numbers<[1], [0], [0], [1], [0, 0, 1, 1], [], []>} : vector<16x64xbf16>, vector<64x32xbf16>, vector<16x32xf32> -> vector<16x32xf32>
    %c0_100 = arith.constant 0 : index
    %c0_101 = arith.constant 0 : index
    %c0_102 = arith.constant 0 : index
    %256 = vector.load %arg16[%c0_100, %c0_101, %c0_102] : memref<1x1x32xf32, #tpu.memory_space<vmem>>, vector<1x1x32xf32>
    %257 = vector.shape_cast %256 : vector<1x1x32xf32> to vector<1x32xf32>
    %258 = vector.broadcast %257 : vector<1x32xf32> to vector<16x32xf32>
    %259 = arith.addf %255, %258 : vector<16x32xf32>
    %260 = arith.addf %259, %230 : vector<16x32xf32>
    %c0_103 = arith.constant 0 : index
    %c0_104 = arith.constant 0 : index
    %c0_105 = arith.constant 0 : index
    %261 = vector.load %arg17[%c0_103, %c0_104, %c0_105] : memref<1x1x32xf32, #tpu.memory_space<vmem>>, vector<1x1x32xf32>
    %262 = vector.shape_cast %261 : vector<1x1x32xf32> to vector<1x32xf32>
    %c0_106 = arith.constant 0 : index
    %c0_107 = arith.constant 0 : index
    %c0_108 = arith.constant 0 : index
    %263 = vector.load %arg18[%c0_106, %c0_107, %c0_108] : memref<1x1x32xf32, #tpu.memory_space<vmem>>, vector<1x1x32xf32>
    %264 = vector.shape_cast %263 : vector<1x1x32xf32> to vector<1x32xf32>
    %cst_109 = arith.constant dense<0.000000e+00> : vector<16xf32>
    %265 = vector.multi_reduction <add>, %260, %cst_109 [1] : vector<16x32xf32> to vector<16xf32>
    %266 = vector.shape_cast %265 : vector<16xf32> to vector<16x1xf32>
    %cst_110 = arith.constant 3.200000e+01 : f32
    %267 = vector.broadcast %cst_110 : f32 to vector<16x1xf32>
    %268 = arith.divf %266, %267 : vector<16x1xf32>
    %269 = vector.broadcast %268 : vector<16x1xf32> to vector<16x32xf32>
    %270 = arith.subf %260, %269 : vector<16x32xf32>
    %271 = arith.mulf %270, %270 : vector<16x32xf32>
    %cst_111 = arith.constant dense<0.000000e+00> : vector<16xf32>
    %272 = vector.multi_reduction <add>, %271, %cst_111 [1] : vector<16x32xf32> to vector<16xf32>
    %273 = vector.shape_cast %272 : vector<16xf32> to vector<16x1xf32>
    %cst_112 = arith.constant 3.200000e+01 : f32
    %274 = vector.broadcast %cst_112 : f32 to vector<16x1xf32>
    %275 = arith.divf %273, %274 : vector<16x1xf32>
    %276 = vector.broadcast %268 : vector<16x1xf32> to vector<16x32xf32>
    %277 = arith.subf %260, %276 : vector<16x32xf32>
    %cst_113 = arith.constant 9.99999996E-13 : f32
    %278 = vector.broadcast %cst_113 : f32 to vector<16x1xf32>
    %279 = arith.addf %275, %278 : vector<16x1xf32>
    %280 = math.rsqrt %279 : vector<16x1xf32>
    %281 = vector.broadcast %280 : vector<16x1xf32> to vector<16x32xf32>
    %282 = arith.mulf %277, %281 : vector<16x32xf32>
    %283 = vector.broadcast %262 : vector<1x32xf32> to vector<16x32xf32>
    %284 = arith.mulf %282, %283 : vector<16x32xf32>
    %285 = vector.broadcast %264 : vector<1x32xf32> to vector<16x32xf32>
    %286 = arith.addf %284, %285 : vector<16x32xf32>
    %c0_114 = arith.constant 0 : index
    %c0_115 = arith.constant 0 : index
    %287 = vector.load %arg22[%c0_114, %c0_115] : memref<16x32xf32, #tpu.memory_space<vmem>>, vector<16x32xf32>
    tpu.vector_store %arg22[%c0_114, %c0_115], %286 {strides = array<i32>} : memref<16x32xf32, #tpu.memory_space<vmem>>, vector<16x32xf32>,
    %288 = arith.truncf %286 : vector<16x32xf32> to vector<16x32xbf16>
    %c0_116 = arith.constant 0 : index
    %c0_117 = arith.constant 0 : index
    %289 = vector.load %arg19[%c0_116, %c0_117] : memref<32x128xbf16, #tpu.memory_space<vmem>>, vector<32x128xbf16>
    %cst_118 = arith.constant dense<0.000000e+00> : vector<16x128xf32>
    %290 = tpu.matmul %288, %289, %cst_118 {dimension_numbers = #tpu.dot_dimension_numbers<[1], [0], [0], [1], [0, 0, 1, 1], [], []>} : vector<16x32xbf16>, vector<32x128xbf16>, vector<16x128xf32> -> vector<16x128xf32>
    %c0_119 = arith.constant 0 : index
    %c0_120 = arith.constant 0 : index
    %291 = vector.load %arg20[%c0_119, %c0_120] : memref<1x128xf32, #tpu.memory_space<vmem>>, vector<1x128xf32>
    %292 = vector.broadcast %291 : vector<1x128xf32> to vector<16x128xf32>
    %293 = arith.addf %290, %292 : vector<16x128xf32>
    %c0_121 = arith.constant 0 : index
    %c0_122 = arith.constant 0 : index
    %c0_123 = arith.constant 0 : index
    %294 = vector.load %arg21[%c0_121, %c0_122, %c0_123] : memref<1x16x128xf32, #tpu.memory_space<vmem>>, vector<1x16x128xf32>
    %295 = vector.shape_cast %294 : vector<1x16x128xf32> to vector<16x128xf32>
    %296 = vector.shape_cast %293 : vector<16x128xf32> to vector<1x16x128xf32>
    tpu.vector_store %arg21[%c0_121, %c0_122, %c0_123], %296 {strides = array<i32>} : memref<1x16x128xf32, #tpu.memory_space<vmem>>, vector<1x16x128xf32>,
    return
  }
  func.func @transform_0(%arg0: i32) -> (i32, i32, i32) {
    %c0_i32 = arith.constant 0 : i32
    %c0_i32_0 = arith.constant 0 : i32
    %c0_i32_1 = arith.constant 0 : i32
    return %arg0, %c0_i32, %c0_i32_0 : i32, i32, i32
  }
  func.func @transform_1(%arg0: i32) -> (i32, i32) {
    %c0_i32 = arith.constant 0 : i32
    %c0_i32_0 = arith.constant 0 : i32
    %c0_i32_1 = arith.constant 0 : i32
    return %c0_i32, %c0_i32_0 : i32, i32
  }
  func.func @transform_2(%arg0: i32) -> (i32, i32, i32, i32) {
    %c0_i32 = arith.constant 0 : i32
    %c0_i32_0 = arith.constant 0 : i32
    %c0_i32_1 = arith.constant 0 : i32
    %c0_i32_2 = arith.constant 0 : i32
    return %arg0, %c0_i32, %c0_i32_0, %c0_i32_1 : i32, i32, i32, i32
  }
  func.func @transform_3(%arg0: i32) -> (i32, i32, i32, i32) {
    %c0_i32 = arith.constant 0 : i32
    %c0_i32_0 = arith.constant 0 : i32
    %c0_i32_1 = arith.constant 0 : i32
    %c0_i32_2 = arith.constant 0 : i32
    return %arg0, %c0_i32, %c0_i32_0, %c0_i32_1 : i32, i32, i32, i32
  }
  func.func @transform_4(%arg0: i32) -> (i32, i32, i32, i32) {
    %c0_i32 = arith.constant 0 : i32
    %c0_i32_0 = arith.constant 0 : i32
    %c0_i32_1 = arith.constant 0 : i32
    %c0_i32_2 = arith.constant 0 : i32
    return %arg0, %c0_i32, %c0_i32_0, %c0_i32_1 : i32, i32, i32, i32
  }
  func.func @transform_5(%arg0: i32) -> (i32, i32, i32, i32) {
    %c0_i32 = arith.constant 0 : i32
    %c0_i32_0 = arith.constant 0 : i32
    %c0_i32_1 = arith.constant 0 : i32
    %c0_i32_2 = arith.constant 0 : i32
    return %arg0, %c0_i32, %c0_i32_0, %c0_i32_1 : i32, i32, i32, i32
  }
  func.func @transform_6(%arg0: i32) -> (i32, i32, i32, i32) {
    %c0_i32 = arith.constant 0 : i32
    %c0_i32_0 = arith.constant 0 : i32
    %c0_i32_1 = arith.constant 0 : i32
    %c0_i32_2 = arith.constant 0 : i32
    return %arg0, %c0_i32, %c0_i32_0, %c0_i32_1 : i32, i32, i32, i32
  }
  func.func @transform_7(%arg0: i32) -> (i32, i32, i32, i32) {
    %c0_i32 = arith.constant 0 : i32
    %c0_i32_0 = arith.constant 0 : i32
    %c0_i32_1 = arith.constant 0 : i32
    %c0_i32_2 = arith.constant 0 : i32
    return %arg0, %c0_i32, %c0_i32_0, %c0_i32_1 : i32, i32, i32, i32
  }
  func.func @transform_8(%arg0: i32) -> (i32, i32, i32, i32) {
    %c0_i32 = arith.constant 0 : i32
    %c0_i32_0 = arith.constant 0 : i32
    %c0_i32_1 = arith.constant 0 : i32
    %c0_i32_2 = arith.constant 0 : i32
    return %arg0, %c0_i32, %c0_i32_0, %c0_i32_1 : i32, i32, i32, i32
  }
  func.func @transform_9(%arg0: i32) -> (i32, i32, i32) {
    %c0_i32 = arith.constant 0 : i32
    %c0_i32_0 = arith.constant 0 : i32
    %c0_i32_1 = arith.constant 0 : i32
    return %arg0, %c0_i32, %c0_i32_0 : i32, i32, i32
  }
  func.func @transform_10(%arg0: i32) -> (i32, i32, i32) {
    %c0_i32 = arith.constant 0 : i32
    %c0_i32_0 = arith.constant 0 : i32
    %c0_i32_1 = arith.constant 0 : i32
    return %arg0, %c0_i32, %c0_i32_0 : i32, i32, i32
  }
  func.func @transform_11(%arg0: i32) -> (i32, i32, i32) {
    %c0_i32 = arith.constant 0 : i32
    %c0_i32_0 = arith.constant 0 : i32
    %c0_i32_1 = arith.constant 0 : i32
    return %arg0, %c0_i32, %c0_i32_0 : i32, i32, i32
  }
  func.func @transform_12(%arg0: i32) -> (i32, i32, i32) {
    %c0_i32 = arith.constant 0 : i32
    %c0_i32_0 = arith.constant 0 : i32
    %c0_i32_1 = arith.constant 0 : i32
    return %arg0, %c0_i32, %c0_i32_0 : i32, i32, i32
  }
  func.func @transform_13(%arg0: i32) -> (i32, i32, i32) {
    %c0_i32 = arith.constant 0 : i32
    %c0_i32_0 = arith.constant 0 : i32
    %c0_i32_1 = arith.constant 0 : i32
    return %arg0, %c0_i32, %c0_i32_0 : i32, i32, i32
  }
  func.func @transform_14(%arg0: i32) -> (i32, i32, i32) {
    %c0_i32 = arith.constant 0 : i32
    %c0_i32_0 = arith.constant 0 : i32
    %c0_i32_1 = arith.constant 0 : i32
    return %arg0, %c0_i32, %c0_i32_0 : i32, i32, i32
  }
  func.func @transform_15(%arg0: i32) -> (i32, i32, i32) {
    %c0_i32 = arith.constant 0 : i32
    %c0_i32_0 = arith.constant 0 : i32
    %c0_i32_1 = arith.constant 0 : i32
    return %arg0, %c0_i32, %c0_i32_0 : i32, i32, i32
  }
  func.func @transform_16(%arg0: i32) -> (i32, i32, i32) {
    %c0_i32 = arith.constant 0 : i32
    %c0_i32_0 = arith.constant 0 : i32
    %c0_i32_1 = arith.constant 0 : i32
    return %arg0, %c0_i32, %c0_i32_0 : i32, i32, i32
  }
  func.func @transform_17(%arg0: i32) -> (i32, i32, i32) {
    %c0_i32 = arith.constant 0 : i32
    %c0_i32_0 = arith.constant 0 : i32
    %c0_i32_1 = arith.constant 0 : i32
    return %arg0, %c0_i32, %c0_i32_0 : i32, i32, i32
  }
  func.func @transform_18(%arg0: i32) -> (i32, i32) {
    %c0_i32 = arith.constant 0 : i32
    %c0_i32_0 = arith.constant 0 : i32
    %c0_i32_1 = arith.constant 0 : i32
    return %c0_i32, %c0_i32_0 : i32, i32
  }
  func.func @transform_19(%arg0: i32) -> (i32, i32) {
    %c0_i32 = arith.constant 0 : i32
    %c0_i32_0 = arith.constant 0 : i32
    %c0_i32_1 = arith.constant 0 : i32
    return %c0_i32, %c0_i32_0 : i32, i32
  }
  func.func @transform_20(%arg0: i32) -> (i32, i32, i32) {
    %c0_i32 = arith.constant 0 : i32
    %c0_i32_0 = arith.constant 0 : i32
    %c0_i32_1 = arith.constant 0 : i32
    return %arg0, %c0_i32, %c0_i32_0 : i32, i32, i32
  }
}

</mosaic_0001>

<bundles_post_ra>
// kernel: eq.8
= control target key start
LH: loop header
LB: loop body
LE: loop exit
PB: predicated region body
PF: predicated region fallthrough
CT: control target
= control target key end

     0   :  { %vm7_vm0 = vcmask 64512   ;;  %vm13_vm1 = vcmask 130112   ;;  %s39_s0 = inlined_call_operand.vmem [shape: s32[2,8], index: 0, kind: input, shape index: {}]   ;;  %s40_s1 = inlined_call_operand.vmem [shape: s32[16], index: 1, kind: output, shape index: {}]  }
   0x1   :  { %v4_v0 = vld [vmem:[%s39_s0] sm:$0x3]  ;;  %s22_s0 = smov 8  }
   0x2   :  { %5 = vst [vmem:[#allocation1] sm:$0x3] %v4_v0 }
   0x9   :  { %v10_v1 = vld [vmem:[#allocation1 + $0x1] sm:$0x1]   ;;  %v6_v2 = vld [vmem:[#allocation1] sm:$0x1]  }
   0xa   :  { %11 = vrot.lane.b32.xlu0 %v10_v1, %s22_s0  ;;  %8 = vst.msk [vmem:[#allocation0] sm:$0x1] %vm7_vm0, %v6_v2  }
  0x7c   :  { %v12_v3 = vpop.permute.xlu0 %11  }
  0x7d   :  { %14 = vst.msk [vmem:[#allocation0] sm:$0x1] %vm13_vm1, %v12_v3  }
  0x84   :  { %v17_v4 = vld [vmem:[#allocation0] sm:$0x1] }
  0x85   :  { %20 = vst [vmem:[%s40_s1] sm:$0x1] %v17_v4 }

// kernel: hsum_forward.1
= control target key start
LH: loop header
LB: loop body
LE: loop exit
PB: predicated region body
PF: predicated region fallthrough
CT: control target
= control target key end

     0   :  { %s3009_s0 = inlined_call_operand.vmem [shape: f32[3,16,32], index: 0, kind: input, shape index: {}]   ;;  %s3010_s1 = inlined_call_operand.vmem [shape: f32[16,16], index: 1, kind: input, shape index: {}]   ;;  %s3011_s2 = inlined_call_operand.vmem [shape: bf16[3,4,32,8], index: 2, kind: input, shape index: {}]   ;;  %s3012_s3 = inlined_call_operand.vmem [shape: f32[3,4,1,8], index: 3, kind: input, shape index: {}]   ;;  %s3013_s4 = inlined_call_operand.vmem [shape: bf16[3,4,32,8], index: 4, kind: input, shape index: {}]   ;;  %s3014_s5 = inlined_call_operand.vmem [shape: f32[3,4,1,8], index: 5, kind: input, shape index: {}]   ;;  %s3015_s6 = inlined_call_operand.vmem [shape: bf16[3,4,32,8], index: 6, kind: input, shape index: {}]   ;;  %s3016_s7 = inlined_call_operand.vmem [shape: f32[3,4,1,8], index: 7, kind: input, shape index: {}]   ;;  %s3017_s8 = inlined_call_operand.vmem [shape: bf16[3,4,8,32], index: 8, kind: input, shape index: {}]   ;;  %s3018_s9 = inlined_call_operand.vmem [shape: f32[3,1,32], index: 9, kind: input, shape index: {}]   ;;  %s3019_s10 = inlined_call_operand.vmem [shape: f32[3,1,32], index: 10, kind: input, shape index: {}]   ;;  %s3020_s11 = inlined_call_operand.vmem [shape: f32[3,1,32], index: 11, kind: input, shape index: {}]   ;;  %s3021_s12 = inlined_call_operand.vmem [shape: bf16[3,32,64], index: 12, kind: input, shape index: {}]   ;;  %s3022_s13 = inlined_call_operand.vmem [shape: f32[3,1,64], index: 13, kind: input, shape index: {}]   ;;  %s3023_s14 = inlined_call_operand.vmem [shape: bf16[3,64,32], index: 14, kind: input, shape index: {}]   ;;  %s3024_s15 = inlined_call_operand.vmem [shape: f32[3,1,32], index: 15, kind: input, shape index: {}]   ;;  %s3025_s16 = inlined_call_operand.vmem [shape: f32[3,1,32], index: 16, kind: input, shape index: {}]   ;;  %s3026_s17 = inlined_call_operand.vmem [shape: f32[3,1,32], index: 17, kind: input, shape index: {}]   ;;  %s3027_s18 = inlined_call_operand.vmem [shape: bf16[32,128], index: 18, kind: input, shape index: {}]   ;;  %s3028_s19 = inlined_call_operand.vmem [shape: f32[1,128], index: 19, kind: input, shape index: {}]   ;;  %s3029_s20 = inlined_call_operand.vmem [shape: f32[3,16,128], index: 20, kind: output, shape index: {}]  }
   0x1   :  { %3037 = sst [smem:[#allocation8_spill]] %s3009_s0 }
   0x2   :  { %3038 = sst [smem:[#allocation9_spill]] %s3010_s1  ;;  %s2678_s1 = smov 0  }
   0x3   :  { %3039 = sst [smem:[#allocation10_spill]] %s3011_s2 }
   0x4   :  { %3040 = sst [smem:[#allocation11_spill]] %s3012_s3 }
   0x5   :  { %3041 = sst [smem:[#allocation12_spill]] %s3013_s4 }
   0x6   :  { %3042 = sst [smem:[#allocation13_spill]] %s3014_s5 }
   0x7   :  { %3043 = sst [smem:[#allocation14_spill]] %s3015_s6 }
   0x8   :  { %3044 = sst [smem:[#allocation15_spill]] %s3016_s7 }
   0x9   :  { %3045 = sst [smem:[#allocation16_spill]] %s3017_s8 }
   0xa   :  { %3046 = sst [smem:[#allocation17_spill]] %s3020_s11 }
   0xb   :  { %3047 = sst [smem:[#allocation18_spill]] %s3021_s12 }
   0xc   :  { %3048 = sst [smem:[#allocation19_spill]] %s3022_s13 }
   0xd   :  { %3049 = sst [smem:[#allocation20_spill]] %s3026_s17 }
   0xe   :  { %3050 = sst [smem:[#allocation21_spill]] %s3027_s18 }
   0xf   :  { %3051 = sst [smem:[#allocation22_spill]] %s3028_s19 }
  0x10   :  { %3052 = sst [smem:[#allocation23_spill]] %s3029_s20 }
  0x11 LB: > { %3053 = sst [smem:[#allocation3_spill]] %s2569_s1  ;;  %s2684_s22 = sadd.s32 4294967295, %s2569_s1   ;;  %s2569_s1 = sphi %s2678_s1, %s30_s1  }
  0x12   : > { %3054 = sst [smem:[#allocation4_spill]] %s2684_s22  ;;  %p2255_p0 = scmp.ge.s32.totalorder %s2569_s1, 1 }
  0x13   : > { %p705_p1 = scmp.lt.s32.totalorder %s2569_s1, 4 }
  0x15   : > { %p706_p2 = pnand %p2255_p0, %p705_p1 }
  0x17   : > { %709 = sbr.rel (%p706_p2) target bundleno = 3398 (0xd46), region = 100 }
  0x1c   : > { %p826_p3 = scmp.lt.s32.totalorder %s2684_s22, 2  ;;  %s3055_s26 = sld [smem:[#allocation8_spill]] }
  0x1d   : > { %s3057_s29 = sld [smem:[#allocation10_spill]] }
  0x1e   : > { %s2690_s23 = scalar_select %p826_p3, %s2684_s22, 2 }
  0x1f   : > { %s3059_s19 = sld [smem:[#allocation12_spill]] }
  0x20   : > { %s2445_s24 = sshll.u32 %s2690_s23, 4  ;;  %s2446_s2 = sshll.u32 %s2690_s23, 6 }
  0x21   : > { %s2260_s0 = sshll.u32 %s2690_s23, 2  ;;  %s3061_s17 = sld [smem:[#allocation11_spill]] }
  0x22   : > { %s2697_s27 = scalar_lea.vmem %s3055_s26, %s2445_s24  ;;  %s3062_s5 = sld [smem:[#allocation13_spill]] }
  0x23   : > { %3056 = sst [smem:[#allocation5_spill]] %s2697_s27  ;;  %s2702_s30 = scalar_lea.vmem %s3057_s29, %s2446_s2 }
  0x24   : > { %3058 = sst [smem:[#allocation6_spill]] %s2702_s30  ;;  %s887_s3 = scalar_lea.vmem %s3024_s15, %s2690_s23 }
  0x25   : > { %s2708_s18 = scalar_lea.vmem %s3059_s19, %s2446_s2  ;;  %s3063_s6 = sld [smem:[#allocation14_spill]] }
  0x26   : > { %3060 = sst [smem:[#allocation7_spill]] %s2708_s18  ;;  %s890_s30 = scalar_lea.vmem %s3025_s16, %s2690_s23 }
  0x27   : > { %s2713_s25 = scalar_lea.vmem %s3061_s17, %s2260_s0  ;;  %s3064_s7 = sld [smem:[#allocation15_spill]] }
  0x28   : > { %s2718_s27 = scalar_lea.vmem %s3062_s5, %s2260_s0  ;;  %s3065_s8 = sld [smem:[#allocation16_spill]] }
  0x29   : > { %s3067_s12 = sld [smem:[#allocation18_spill]] }
  0x2a   : > { %s3071_s20 = sld [smem:[#allocation4_spill]] }
  0x2b   : > { %s2723_s29 = scalar_lea.vmem %s3063_s6, %s2446_s2 }
  0x2d   : > { %s2728_s19 = scalar_lea.vmem %s3064_s7, %s2260_s0  ;;  %s3070_s7 = sld [smem:[#allocation23_spill]] }
  0x2e   : > { %s2733_s17 = scalar_lea.vmem %s3065_s8, %s2445_s24  ;;  %s2451_s8 = sshll.u32 %s2690_s23, 5 }
  0x2f   : > { %s2750_s1 = scalar_lea.vmem %s3067_s12, %s2445_s24  ;;  %s2764_s28 = scalar_lea.vmem %s3023_s14, %s2451_s8 }
  0x30   : > { %s3069_s12 = sld [smem:[#allocation20_spill]]  ;;  %p2275_p4 = scmp.ne.s32.totalorder %s3071_s20, 0 }
  0x32   : > { %903 = sbr.rel (%p2275_p4) target bundleno = 58 (0x3a), region = 104 }
  0x33   : > { %s2777_s13 = scalar_lea.vmem %s3070_s7, %s2445_s24 }
  0x36   : > { %s893_s11 = scalar_lea.vmem %s3069_s12, %s2690_s23 }
  0x37   : > { %vm904_vm0 = vcmask 261120   ;;  %v2571_v0 = vmov 0.0  }
  0x38   : > { %905 = vst.msk [vmem:[#allocation2] sm:$0xff] %vm904_vm0, %v2571_v0 }
  0x39   : > { %906 = vst.msk [vmem:[#allocation2 + $0x8] sm:$0xff] %vm904_vm0, %v2571_v0 }
  0x3a PF: > { %s3072_s8 = sld [smem:[#allocation7_spill]]  ;;  %vm995_vm1 = vcmask 261120   ;;  %v2497_v13 = vld [vmem:[%s2718_s27] ss:$0 sm:$0xff]  ;;  %vm1071_vm2 = vcmask 64512   ;;  %v2470_v22 = vld [vmem:[%s2723_s29 + $0x8] sm:$0xff] }
  0x3b   : > { %s3073_s22 = sld [smem:[#allocation6_spill]]  ;;  %v2498_v16 = vld [vmem:[%s2713_s25] ss:$0 sm:$0xff]  ;;  %1063 = vmatpush.bf16.msra.mxu2 %v2470_v22  ;;  %vm1111_vm3 = vcmask 130048   ;;  %v2472_v54 = vld [vmem:[%s2723_s29 + $0x18] sm:$0xff]  ;;  %v2471_v56 = vld [vmem:[%s2723_s29 + $0x10] sm:$0xff] }
  0x3c   : > { %s3074_s5 = sld [smem:[#allocation5_spill]]  ;;  %v2469_v23 = vld [vmem:[%s2723_s29] sm:$0xff]  ;;  %vm1325_vm4 = vcmask 1043456   ;;  %vm1907_vm12 = vcmask 523264  }
  0x3d   : > { %s3075_s12 = sld [smem:[#allocation9_spill]]  ;;  %v2499_v50 = vld [vmem:[%s2728_s19] ss:$0 sm:$0xff]  ;;  %v2500_v57 = vld [vmem:[%s2718_s27 + $0x1] ss:$0 sm:$0xff] }
  0x3e   : > { %v2501_v62 = vld [vmem:[%s2713_s25 + $0x1] ss:$0 sm:$0xff]  ;;  %s3078_s0 = sld [smem:[#allocation17_spill]] }
  0x3f   : > { %v907_v4 = vld [vmem:[#allocation2] sm:$0xff]  ;;  %1064 = vmatpush.bf16.msra.mxu2 %v2469_v23  ;;  %s3082_s7 = sld [smem:[#allocation21_spill]] }
  0x40   : > { %v2462_v1 = vld [vmem:[%s3072_s8 + $0x8] sm:$0xff]  ;;  %v2461_v2 = vld [vmem:[%s3072_s8] sm:$0xff]  ;;  %v2464_v24 = vld [vmem:[%s3072_s8 + $0x18] sm:$0xff] }
  0x41   : > { %v2454_v3 = vld [vmem:[%s3073_s22 + $0x8] sm:$0xff]  ;;  %1034 = vmatpush.bf16.msra.mxu1 %v2462_v1  ;;  %v2453_v9 = vld [vmem:[%s3073_s22] sm:$0xff]  ;;  %v2463_v25 = vld [vmem:[%s3072_s8 + $0x10] sm:$0xff] }
  0x42   : > { %v908_v5 = vld [vmem:[#allocation2 + $0x8] sm:$0xff]  ;;  %v909_v6 = vld [vmem:[%s3074_s5] sm:$0xff]  ;;  %1005 = vmatpush.bf16.msra.mxu0 %v2454_v3  ;;  %v2456_v36 = vld [vmem:[%s3073_s22 + $0x18] sm:$0xff] }
  0x43   : > { %v910_v7 = vld [vmem:[%s3074_s5 + $0x8] sm:$0xff]  ;;  %v2785_v8 = vadd.f32 %v909_v6, %v907_v4  ;;  %1204 = vmatpush.bf16.msrb.mxu2 %v2464_v24  ;;  %v2813_v27 = vld [vmem:[%s3075_s12] sm:$0xff]  ;;  %v2455_v37 = vld [vmem:[%s3073_s22 + $0x10] sm:$0xff] }
  0x44   : > { %v2788_v10 = vadd.f32 %v910_v7, %v908_v5  ;;  %v2822_v32 = vld [vmem:[%s3075_s12 + $0x8] sm:$0xff]  ;;  %s3079_s18 = scalar_lea.vmem %s3078_s0, %s2690_s23 }
  0x45   : > { %1035 = vmatpush.bf16.msra.mxu1 %v2461_v2 }
  0x46   : > { %v2792_v11 = vpack.c.bf16 %v2788_v10, %v2785_v8  ;;  %1006 = vmatpush.bf16.msra.mxu0 %v2453_v9 }
  0x47   : > { %1205 = vmatpush.bf16.msrb.mxu2 %v2463_v25 }
  0x48   : > { %2293 = vmatmul.msk.bf16.vlgmr.msra.gmra.mxu1 %vm995_vm1, %v2792_v11  ;;  %2302 = vmatmul.msk.bf16.vlgmr.msra.gmra.mxu2 %vm995_vm1, %v2792_v11 }
  0x49   : > { %2284 = vmatmul.msk.bf16.vlgmr.msra.gmra.mxu0 %vm995_vm1, %v2792_v11  ;;  %1175 = vmatpush.bf16.msrb.mxu1 %v2456_v36 }
  0x4d   : > { %1176 = vmatpush.bf16.msrb.mxu1 %v2455_v37 }
  0x58   : > { %2325 = vmatmul.msk.bf16.vlgmr.msrb.gmra.mxu2 %vm995_vm1, %v2792_v11  ;;  %2316 = vmatmul.msk.bf16.vlgmr.msrb.gmra.mxu1 %vm995_vm1, %v2792_v11 }
  0xc5   : > { %v1037_v12 = vpop.f32.mrf.mxu1 }
  0xc6   : > { %v1008_v17 = vpop.f32.mrf.mxu0  ;;  %v1038_v18 = vadd.f32 %v2497_v13, %v1037_v12 }
  0xc7   : > { %v1009_v19 = vadd.f32 %v2498_v16, %v1008_v17 }
  0xcb   : > { %v1066_v48 = vpop.f32.mrf.mxu2 }
  0xcc   : > { %v1067_v51 = vadd.f32 %v2499_v50, %v1066_v48 }
  0xcd   : > { %v1039_v14 = vpop.f32.mrf.mxu1 }
  0xce   : > { %v1040_v15 = vadd.f32 %v2497_v13, %v1039_v14  ;;  %v1010_v20 = vpop.f32.mrf.mxu0  ;;  %v2502_v13 = vld [vmem:[%s2728_s19 + $0x1] ss:$0 sm:$0xff] }
  0xcf   : > { %v1011_v21 = vadd.f32 %v2498_v16, %v1010_v20  ;;  %v964_v14 = vld [vmem:[%s2733_s17] sm:$0xf] }
  0xd0   : > { %2303 = vmatpush.xpose.msk.msra.mxu3 %vm1071_vm2, %v1040_v15  ;;  %v1347_v16 = vsel %vm1325_vm4, %v964_v14, 0 }
  0xd3   : > { %v1068_v49 = vpop.f32.mrf.mxu2 }
  0xd4   : > { %2304 = vmatpush.xpose.msk.msra.mxu3 %vm1071_vm2, %v1038_v18  ;;  %v1069_v52 = vadd.f32 %v2499_v50, %v1068_v49 }
  0xd5   : > { %v1178_v61 = vpop.f32.mrf.mxu1 }
  0xd6   : > { %v1135_v53 = vpack.c.bf16 %v1069_v52, %v1067_v51  ;;  %v1179_v9 = vadd.f32 %v2501_v62, %v1178_v61 }
  0xd7   : > { %2305 = vmatmul.msk.f32.vlgmr.msra.gmra.mxu3 %vm1071_vm2, %v1009_v19 }
  0xd8   : > { %1146 = vmatpush.bf16.msrb.mxu0 %v1135_v53  ;;  %1233 = vmatpush.bf16.msrb.mxu3 %v2472_v54  ;;  %v965_v54 = vld [vmem:[%s2733_s17 + $0x4] sm:$0xf] }
  0xdb   : > { %v1207_v55 = vpop.f32.mrf.mxu2 }
  0xdc   : > { %1234 = vmatpush.bf16.msrb.mxu3 %v2471_v56  ;;  %v1208_v60 = vadd.f32 %v2500_v57, %v1207_v55  ;;  %v1327_v55 = vsel %vm1325_vm4, %v965_v54, 0  ;;  %v2506_v54 = vld [vmem:[%s2718_s27 + $0x3] ss:$0 sm:$0xff] }
  0xdd   : > { %v1180_v63 = vpop.f32.mrf.mxu1  ;;  %1336 = vmatpush.bf16.msra.mxu2 %v1327_v55 }
  0xde   : > { %v1181_v0 = vadd.f32 %v2501_v62, %v1180_v63  ;;  %v2504_v63 = vld [vmem:[%s2713_s25 + $0x2] ss:$0 sm:$0xff] }
  0xdf   : > { %2306 = vmatmul.msk.f32.gmra.mxu3 %vm1071_vm2, %v1011_v21 }
  0xe3   : > { %v1209_v58 = vpop.f32.mrf.mxu2 }
  0xe4   : > { %v1210_v59 = vadd.f32 %v2500_v57, %v1209_v58 }
  0xe6   : > { %2335 = vmatpush.xpose.msk.msra.mxu0 %vm1071_vm2, %v1210_v59  ;;  %2485 = vmatpush.xpose.msk.msra.mxu3 %vm1071_vm2, %v1210_v59 }
  0xe7   : > { %2334 = vmatmul.msk.bf16.vlgmr.msrb.gmra.mxu3 %vm995_vm1, %v2792_v11 }
  0xea   : > { %2336 = vmatpush.xpose.msk.msra.mxu0 %vm1071_vm2, %v1208_v60  ;;  %2486 = vmatpush.xpose.msk.msra.mxu3 %vm1071_vm2, %v1208_v60  ;;  %v2503_v60 = vld [vmem:[%s2718_s27 + $0x2] ss:$0 sm:$0xff] }
  0xee   : > { %1356 = vmatpush.bf16.msrb.mxu3 %v1347_v16 }
  0xf7   : > { %2338 = vmatmul.msk.f32.vlgmr.msra.gmra.mxu3 %vm1071_vm2, %v1181_v0 }
 0x15a   : > { %v1101_v26 = vpop.f32.mrf.mxu3 }
 0x15b   : > { %v1107_v28 = vmul.f32 0.35355338, %v1101_v26 }
 0x15d   : > { %v1109_v29 = vadd.f32 %v1107_v28, %v2813_v27 }
 0x15f   : > { %v1112_v30 = vsel %vm1111_vm3, %v1109_v29, -inf }
 0x160   : > { %1113 = vmax.xlane.f32.xlu0 %v1112_v30 }
 0x162   : > { %v1104_v31 = vpop.f32.mrf.mxu3 }
 0x163   : > { %v1108_v33 = vmul.f32 0.35355338, %v1104_v31 }
 0x165   : > { %v1110_v34 = vadd.f32 %v1108_v33, %v2822_v32 }
 0x167   : > { %v1115_v35 = vsel %vm1111_vm3, %v1110_v34, -inf }
 0x168   : > { %1116 = vmax.xlane.f32.xlu0 %v1115_v35 }
 0x16a   : > { %v1236_v12 = vpop.f32.mrf.mxu3 }
 0x16b   : > { %v1237_v15 = vadd.f32 %v2502_v13, %v1236_v12 }
 0x172   : > { %v1238_v17 = vpop.f32.mrf.mxu3 }
 0x173   : > { %v1239_v18 = vadd.f32 %v2502_v13, %v1238_v17 }
 0x175   : > { %v1303_v19 = vpack.c.bf16 %v1239_v18, %v1237_v15 }
 0x177   : > { %1314 = vmatpush.bf16.msra.mxu1 %v1303_v19 }
 0x17a   : > { %v1273_v25 = vpop.f32.mrf.mxu3 }
 0x17b   : > { %v1277_v28 = vmul.f32 0.35355338, %v1273_v25 }
 0x17d   : > { %v1279_v30 = vadd.f32 %v1277_v28, %v2822_v32 }
 0x17f   : > { %v1283_v31 = vsel %vm1111_vm3, %v1279_v30, -inf }
 0x1d3   : > { %v1114_v38 = vpop.xlane.xlu0 %1113 }
 0x1d4   : > { %v1118_v39 = vsub.f32 %v1109_v29, %v1114_v38 }
 0x1d6   : > { %v1120_v40 = vmul.f32 1.442695, %v1118_v39 }
 0x1d8   : > { %2517 = vpow2.f32 %v1120_v40 }
 0x1db   : > { %v1117_v41 = vpop.xlane.xlu0 %1116 }
 0x1dc   : > { %v1119_v42 = vsub.f32 %v1110_v34, %v1117_v41 }
 0x1de   : > { %v2518_v43 = vpop.eup %2517  ;;  %v1122_v44 = vmul.f32 1.442695, %v1119_v42 }
 0x1df   : > { %v1124_v45 = vsel %vm1111_vm3, %v2518_v43, 0.0 }
 0x1e0   : > { %2519 = vpow2.f32 %v1122_v44  ;;  %1125 = vadd.xlane.f32.xlu1 %v1124_v45  ;;  %v2465_v44 = vld [vmem:[%s3072_s8 + $0x20] sm:$0xff]  ;;  %v2458_v45 = vld [vmem:[%s3073_s22 + $0x28] sm:$0xff] }
 0x1e6   : > { %v2520_v46 = vpop.eup %2519 }
 0x1e7   : > { %v1127_v47 = vsel %vm1111_vm3, %v2520_v46, 0.0 }
 0x1e8   : > { %1128 = vadd.xlane.f32.xlu1 %v1127_v47  ;;  %v2457_v47 = vld [vmem:[%s3073_s22 + $0x20] sm:$0xff] }
 0x253   : > { %v1126_v1 = vpop.xlane.xlu1 %1125 }
 0x254   : > { %2521 = vrcp.f32 %v1126_v1 }
 0x25a   : > { %v2522_v3 = vpop.eup %2521 }
 0x25b   : > { %v1129_v2 = vpop.xlane.xlu1 %1128  ;;  %v1132_v5 = vmul.f32 %v2522_v3, %v2518_v43  ;;  %v2466_v43 = vld [vmem:[%s3072_s8 + $0x28] sm:$0xff] }
 0x25c   : > { %2523 = vrcp.f32 %v1129_v2  ;;  %1413 = vmatpush.bf16.msrb.mxu1 %v2466_v43  ;;  %v2459_v43 = vld [vmem:[%s3073_s22 + $0x30] sm:$0xff] }
 0x260   : > { %1414 = vmatpush.bf16.msrb.mxu1 %v2465_v44 }
 0x262   : > { %v2524_v4 = vpop.eup %2523 }
 0x263   : > { %v1133_v6 = vmul.f32 %v2524_v4, %v2520_v46 }
 0x265   : > { %v1134_v7 = vpack.c.bf16 %v1133_v6, %v1132_v5  ;;  %v2474_v6 = vld [vmem:[%s2723_s29 + $0x28] sm:$0xff] }
 0x266   : > { %1442 = vmatpush.bf16.msrb.mxu2 %v2474_v6  ;;  %v2475_v6 = vld [vmem:[%s2723_s29 + $0x30] sm:$0xff] }
 0x267   : > { %2307 = vmatmul.msk.bf16.vlgmr.msrb.gmra.mxu0 %vm1111_vm3, %v1134_v7  ;;  %v2473_v7 = vld [vmem:[%s2723_s29 + $0x20] sm:$0xff] }
 0x268   : > { %1384 = vmatpush.bf16.msrb.mxu0 %v2458_v45 }
 0x26a   : > { %1443 = vmatpush.bf16.msrb.mxu2 %v2473_v7 }
 0x26c   : > { %1385 = vmatpush.bf16.msrb.mxu0 %v2457_v47 }
 0x277   : > { %2337 = vmatmul.msk.f32.vlgmr.msra.gmra.mxu0 %vm1071_vm2, %v1179_v9 }
 0x27f   : > { %2350 = vmatmul.msk.bf16.vlgmr.msrb.gmra.mxu0 %vm995_vm1, %v2792_v11 }
 0x2e4   : > { %v1148_v20 = vpop.f32.mrf.mxu0 }
 0x2ec   : > { %v1150_v21 = vpop.f32.mrf.mxu0 }
 0x2ed   : > { %v1153_v22 = vpack.c.bf16 %v1150_v21, %v1148_v20 }
 0x2ef   : > { %2341 = vmatmul.msk.bf16.vlgmr.msrb.gmra.mxu3 %vm1071_vm2, %v1153_v22 }
 0x2f4   : > { %v1270_v23 = vpop.f32.mrf.mxu0 }
 0x2f5   : > { %v1276_v24 = vmul.f32 0.35355338, %v1270_v23 }
 0x2f7   : > { %v1278_v26 = vadd.f32 %v1276_v24, %v2813_v27 }
 0x2f9   : > { %v1280_v29 = vsel %vm1111_vm3, %v1278_v26, -inf }
 0x2fa   : > { %1281 = vmax.xlane.f32.xlu2 %v1280_v29 }
 0x2fc   : > { %v1387_v0 = vpop.f32.mrf.mxu0 }
 0x2fd   : > { %v1388_v2 = vadd.f32 %v2504_v63, %v1387_v0 }
 0x302   : > { %1284 = vmax.xlane.f32.xlu2 %v1283_v31 }
 0x304   : > { %v1389_v3 = vpop.f32.mrf.mxu0 }
 0x305   : > { %v1390_v4 = vadd.f32 %v2504_v63, %v1389_v3 }
 0x36d   : > { %v1282_v33 = vpop.xlane.xlu2 %1281 }
 0x36e   : > { %v1286_v34 = vsub.f32 %v1278_v26, %v1282_v33  ;;  %v2505_v26 = vld [vmem:[%s2728_s19 + $0x2] ss:$0 sm:$0xff] }
 0x370   : > { %v1288_v35 = vmul.f32 1.442695, %v1286_v34 }
 0x372   : > { %2525 = vpow2.f32 %v1288_v35  ;;  %v2874_v5 = vpop.f32.mrf.mxu3 }
 0x375   : > { %v1285_v36 = vpop.xlane.xlu2 %1284 }
 0x376   : > { %v1287_v37 = vsub.f32 %v1279_v30, %v1285_v36 }
 0x378   : > { %v2526_v38 = vpop.eup %2525  ;;  %v1290_v39 = vmul.f32 1.442695, %v1287_v37 }
 0x379   : > { %v1292_v40 = vsel %vm1111_vm3, %v2526_v38, 0.0 }
 0x37a   : > { %2527 = vpow2.f32 %v1290_v39  ;;  %1293 = vadd.xlane.f32.xlu0 %v1292_v40  ;;  %v2880_v9 = vpop.f32.mrf.mxu3  ;;  %v2468_v40 = vld [vmem:[%s3072_s8 + $0x38] sm:$0xff] }
 0x380   : > { %v2528_v41 = vpop.eup %2527 }
 0x381   : > { %v1295_v42 = vsel %vm1111_vm3, %v2528_v41, 0.0 }
 0x382   : > { %1296 = vadd.xlane.f32.xlu1 %v1295_v42  ;;  %v2460_v42 = vld [vmem:[%s3073_s22 + $0x38] sm:$0xff] }
 0x3ed   : > { %v1294_v46 = vpop.xlane.xlu0 %1293 }
 0x3ee   : > { %2529 = vrcp.f32 %v1294_v46 }
 0x3f4   : > { %v2530_v49 = vpop.eup %2529 }
 0x3f5   : > { %v1297_v48 = vpop.xlane.xlu1 %1296  ;;  %v1300_v51 = vmul.f32 %v2530_v49, %v2526_v38 }
 0x3f6   : > { %2531 = vrcp.f32 %v1297_v48 }
 0x3fc   : > { %v2532_v50 = vpop.eup %2531 }
 0x3fd   : > { %v1301_v52 = vmul.f32 %v2532_v50, %v2528_v41  ;;  %v2467_v41 = vld [vmem:[%s3072_s8 + $0x30] sm:$0xff]  ;;  %s3080_s8 = sld [smem:[#allocation19_spill]] }
 0x3ff   : > { %v1302_v53 = vpack.c.bf16 %v1301_v52, %v1300_v51  ;;  %v966_v52 = vld [vmem:[%s2733_s17 + $0x8] sm:$0xf] }
 0x401   : > { %2339 = vmatmul.msk.bf16.vlgmr.msra.gmra.mxu1 %vm1111_vm3, %v1302_v53  ;;  %v1535_v53 = vsel %vm1325_vm4, %v966_v52, 0 }
 0x402   : > { %1544 = vmatpush.bf16.msra.mxu1 %v1535_v53 }
 0x403   : > { %s3081_s22 = scalar_lea.vmem %s3080_s8, %s2690_s23 }
 0x411   : > { %2359 = vmatmul.msk.bf16.vlgmr.msrb.gmra.mxu1 %vm995_vm1, %v2792_v11 }
 0x47e   : > { %v1316_v56 = vpop.f32.mrf.mxu1 }
 0x486   : > { %v1318_v57 = vpop.f32.mrf.mxu1 }
 0x487   : > { %v1321_v58 = vpack.c.bf16 %v1318_v57, %v1316_v56 }
 0x489   : > { %2340 = vmatmul.msk.bf16.vlgmr.msra.gmra.mxu2 %vm1071_vm2, %v1321_v58 }
 0x48a   : > { %1574 = vmatpush.bf16.msra.mxu2 %v2460_v42 }
 0x48e   : > { %v1416_v59 = vpop.f32.mrf.mxu1  ;;  %1575 = vmatpush.bf16.msra.mxu2 %v2459_v43  ;;  %v967_v43 = vld [vmem:[%s2733_s17 + $0xc] sm:$0xf] }
 0x48f   : > { %v1417_v1 = vadd.f32 %v2503_v60, %v1416_v59 }
 0x496   : > { %v1418_v61 = vpop.f32.mrf.mxu1 }
 0x497   : > { %v1419_v62 = vadd.f32 %v2503_v60, %v1418_v61  ;;  %v2507_v61 = vld [vmem:[%s2713_s25 + $0x3] ss:$0 sm:$0xff] }
 0x499   : > { %2369 = vmatpush.xpose.msk.msra.mxu3 %vm1071_vm2, %v1419_v62  ;;  %2368 = vmatmul.msk.bf16.vlgmr.msrb.gmra.mxu2 %vm995_vm1, %v2792_v11 }
 0x49d   : > { %2370 = vmatpush.xpose.msk.msra.mxu3 %vm1071_vm2, %v1417_v1 }
 0x4a0   : > { %2371 = vmatmul.msk.f32.vlgmr.msra.gmra.mxu3 %vm1071_vm2, %v1388_v2  ;;  %v2476_v2 = vld [vmem:[%s2723_s29 + $0x38] sm:$0xff]  ;;  %s3076_s29 = scalar_lea.vmem %s3018_s9, %s2690_s23 }
 0x4a1   : > { %1603 = vmatpush.bf16.msrb.mxu3 %v2468_v40 }
 0x4a5   : > { %1604 = vmatpush.bf16.msrb.mxu3 %v2467_v41 }
 0x4a8   : > { %2372 = vmatmul.msk.f32.gmra.mxu3 %vm1071_vm2, %v1390_v4 }
 0x4a9   : > { %2383 = vmatmul.msk.bf16.vlgmr.msra.gmra.mxu2 %vm995_vm1, %v2792_v11 }
 0x4b0   : > { %2392 = vmatmul.msk.bf16.vlgmr.msrb.gmra.mxu3 %vm995_vm1, %v2792_v11 }
 0x50c   : > { %v2886_v20 = vpop.f32.mrf.mxu2 }
 0x50d   : > { %v1359_v3 = vadd.f32 %v2874_v5, %v2886_v20 }
 0x514   : > { %v2888_v21 = vpop.f32.mrf.mxu2 }
 0x51c   : > { %v1445_v24 = vpop.f32.mrf.mxu2 }
 0x51d   : > { %v1446_v29 = vadd.f32 %v2505_v26, %v1445_v24 }
 0x523   : > { %v1479_v12 = vpop.f32.mrf.mxu3 }
 0x524   : > { %v1485_v13 = vmul.f32 0.35355338, %v1479_v12  ;;  %v1447_v31 = vpop.f32.mrf.mxu2  ;;  %v1361_v12 = vadd.f32 %v2880_v9, %v2888_v21  ;;  %v2508_v21 = vld [vmem:[%s2728_s19 + $0x3] ss:$0 sm:$0xff] }
 0x525   : > { %v1448_v33 = vadd.f32 %v2505_v26, %v1447_v31 }
 0x526   : > { %v1487_v14 = vadd.f32 %v1485_v13, %v2813_v27 }
 0x527   : > { %v1512_v37 = vpack.c.bf16 %v1448_v33, %v1446_v29 }
 0x528   : > { %v1489_v15 = vsel %vm1111_vm3, %v1487_v14, -inf }
 0x529   : > { %1490 = vmax.xlane.f32.xlu2 %v1489_v15  ;;  %1523 = vmatpush.bf16.msra.mxu0 %v1512_v37 }
 0x52b   : > { %v1482_v16 = vpop.f32.mrf.mxu3 }
 0x52c   : > { %v1486_v17 = vmul.f32 0.35355338, %v1482_v16  ;;  %v1577_v62 = vpop.f32.mrf.mxu2 }
 0x52d   : > { %v1578_v63 = vadd.f32 %v2507_v61, %v1577_v62  ;;  %1632 = vmatpush.bf16.msrb.mxu0 %v2476_v2 }
 0x52e   : > { %v1488_v18 = vadd.f32 %v1486_v17, %v2822_v32 }
 0x530   : > { %v1492_v19 = vsel %vm1111_vm3, %v1488_v18, -inf }
 0x531   : > { %1493 = vmax.xlane.f32.xlu0 %v1492_v19  ;;  %1633 = vmatpush.bf16.msrb.mxu0 %v2475_v6 }
 0x533   : > { %v1606_v51 = vpop.f32.mrf.mxu3 }
 0x534   : > { %v1607_v57 = vadd.f32 %v2506_v54, %v1606_v51  ;;  %v1579_v0 = vpop.f32.mrf.mxu2 }
 0x535   : > { %v1580_v1 = vadd.f32 %v2507_v61, %v1579_v0 }
 0x53b   : > { %v1608_v55 = vpop.f32.mrf.mxu3 }
 0x53c   : > { %v1609_v56 = vadd.f32 %v2506_v54, %v1608_v55 }
 0x53e   : > { %2402 = vmatpush.xpose.msk.msrb.mxu1 %vm1071_vm2, %v1609_v56 }
 0x542   : > { %2403 = vmatpush.xpose.msk.msrb.mxu1 %vm1071_vm2, %v1607_v57 }
 0x59c   : > { %v1491_v22 = vpop.xlane.xlu2 %1490 }
 0x59d   : > { %v1495_v23 = vsub.f32 %v1487_v14, %v1491_v22 }
 0x59f   : > { %v1497_v25 = vmul.f32 1.442695, %v1495_v23 }
 0x5a1   : > { %2533 = vpow2.f32 %v1497_v25 }
 0x5a4   : > { %v1494_v28 = vpop.xlane.xlu0 %1493 }
 0x5a5   : > { %v1496_v30 = vsub.f32 %v1488_v18, %v1494_v28 }
 0x5a7   : > { %v2534_v34 = vpop.eup %2533  ;;  %v1499_v35 = vmul.f32 1.442695, %v1496_v30 }
 0x5a8   : > { %v1501_v36 = vsel %vm1111_vm3, %v2534_v34, 0.0 }
 0x5a9   : > { %2535 = vpow2.f32 %v1499_v35  ;;  %1502 = vadd.xlane.f32.xlu1 %v1501_v36 }
 0x5af   : > { %v2536_v38 = vpop.eup %2535 }
 0x5b0   : > { %v1504_v39 = vsel %vm1111_vm3, %v2536_v38, 0.0 }
 0x5b1   : > { %1505 = vadd.xlane.f32.xlu2 %v1504_v39 }
 0x61c   : > { %v1503_v44 = vpop.xlane.xlu1 %1502 }
 0x61d   : > { %2537 = vrcp.f32 %v1503_v44  ;;  %v1725_v44 = vsel %vm1325_vm4, %v967_v43, 0  ;;  %v2482_v43 = vld [vmem:[%s2764_s28 + $0x18] sm:$0xff] }
 0x61e   : > { %1734 = vmatpush.bf16.msra.mxu3 %v1725_v44  ;;  %v2481_v44 = vld [vmem:[%s2764_s28 + $0x10] sm:$0xff] }
 0x623   : > { %v2538_v46 = vpop.eup %2537 }
 0x624   : > { %v1506_v45 = vpop.xlane.xlu2 %1505  ;;  %v1509_v48 = vmul.f32 %v2538_v46, %v2534_v34 }
 0x625   : > { %2539 = vrcp.f32 %v1506_v45 }
 0x62b   : > { %v2540_v47 = vpop.eup %2539 }
 0x62c   : > { %v1510_v49 = vmul.f32 %v2540_v47, %v2536_v38 }
 0x62e   : > { %v1511_v50 = vpack.c.bf16 %v1510_v49, %v1509_v48  ;;  %v2509_v48 = vld [vmem:[%s3076_s29] ss:$0 sm:$0xff] }
 0x630   : > { %2373 = vmatmul.msk.bf16.vlgmr.msra.gmra.mxu0 %vm1111_vm3, %v1511_v50 }
 0x640   : > { %2401 = vmatmul.msk.bf16.vlgmr.msrb.gmra.mxu0 %vm995_vm1, %v2792_v11 }
 0x6ad   : > { %v1525_v58 = vpop.f32.mrf.mxu0 }
 0x6b5   : > { %v1527_v59 = vpop.f32.mrf.mxu0 }
 0x6b6   : > { %v1530_v60 = vpack.c.bf16 %v1527_v59, %v1525_v58  ;;  %v2572_v59 = vmov 32.0  }
 0x6b8   : > { %2374 = vmatmul.msk.bf16.vlgmr.msra.gmra.mxu1 %vm1071_vm2, %v1530_v60 }
 0x6b9   : > { %1915 = vmatpush.bf16.msra.mxu1 %v2482_v43  ;;  %v2514_v43 = vld [vmem:[%s890_s30] ss:$0 sm:$0xff]  ;;  %s3084_s30 = sld [smem:[#allocation22_spill]] }
 0x6bd   : > { %v1635_v9 = vpop.f32.mrf.mxu0  ;;  %1916 = vmatpush.bf16.msra.mxu1 %v2481_v44 }
 0x6be   : > { %v1636_v24 = vadd.f32 %v2508_v21, %v1635_v9 }
 0x6c5   : > { %v1637_v26 = vpop.f32.mrf.mxu0 }
 0x6c6   : > { %v1638_v28 = vadd.f32 %v2508_v21, %v1637_v26 }
 0x6c8   : > { %2404 = vmatmul.msk.f32.vlgmr.msrb.gmra.mxu1 %vm1071_vm2, %v1578_v63 }
 0x6d0   : > { %2405 = vmatmul.msk.f32.gmra.mxu1 %vm1071_vm2, %v1580_v1 }
 0x735   : > { %v1546_v4 = vpop.f32.mrf.mxu1 }
 0x736   : > { %v1551_v7 = vadd.f32 %v1546_v4, %v1359_v3 }
 0x73d   : > { %v1548_v13 = vpop.f32.mrf.mxu1 }
 0x73e   : > { %v1552_v14 = vadd.f32 %v1548_v13, %v1361_v12 }
 0x745   : > { %v1669_v15 = vpop.f32.mrf.mxu1 }
 0x746   : > { %v1675_v16 = vmul.f32 0.35355338, %v1669_v15  ;;  %v2478_v15 = vld [vmem:[%s2750_s1 + $0x8] sm:$0xff] }
 0x747   : > { %1844 = vmatpush.bf16.msra.mxu0 %v2478_v15 }
 0x748   : > { %v1677_v17 = vadd.f32 %v1675_v16, %v2813_v27  ;;  %v1702_v27 = vpack.c.bf16 %v1638_v28, %v1636_v24 }
 0x74a   : > { %v1679_v5 = vsel %vm1111_vm3, %v1677_v17, -inf  ;;  %1713 = vmatpush.bf16.msrb.mxu2 %v1702_v27 }
 0x74b   : > { %1680 = vmax.xlane.f32.xlu0 %v1679_v5  ;;  %v2477_v5 = vld [vmem:[%s2750_s1] sm:$0xff]  ;;  %s3077_s1 = scalar_lea.vmem %s3019_s10, %s2690_s23 }
 0x74c   : > { %1845 = vmatpush.bf16.msra.mxu0 %v2477_v5 }
 0x74d   : > { %v1672_v18 = vpop.f32.mrf.mxu1 }
 0x74e   : > { %v1676_v19 = vmul.f32 0.35355338, %v1672_v18 }
 0x750   : > { %v1678_v20 = vadd.f32 %v1676_v19, %v2822_v32 }
 0x752   : > { %v1682_v22 = vsel %vm1111_vm3, %v1678_v20, -inf }
 0x753   : > { %1683 = vmax.xlane.f32.xlu1 %v1682_v22 }
 0x7be   : > { %v1681_v23 = vpop.xlane.xlu0 %1680 }
 0x7bf   : > { %v1685_v11 = vsub.f32 %v1677_v17, %v1681_v23 }
 0x7c1   : > { %v1687_v25 = vmul.f32 1.442695, %v1685_v11 }
 0x7c3   : > { %2541 = vpow2.f32 %v1687_v25 }
 0x7c6   : > { %v1684_v29 = vpop.xlane.xlu1 %1683 }
 0x7c7   : > { %v1686_v30 = vsub.f32 %v1678_v20, %v1684_v29 }
 0x7c9   : > { %v2542_v31 = vpop.eup %2541  ;;  %v1689_v33 = vmul.f32 1.442695, %v1686_v30 }
 0x7ca   : > { %v1691_v32 = vsel %vm1111_vm3, %v2542_v31, 0.0 }
 0x7cb   : > { %2543 = vpow2.f32 %v1689_v33  ;;  %1692 = vadd.xlane.f32.xlu2 %v1691_v32  ;;  %v2510_v33 = vld [vmem:[%s3077_s1] ss:$0 sm:$0xff] }
 0x7d1   : > { %v2544_v34 = vpop.eup %2543 }
 0x7d2   : > { %v1694_v35 = vsel %vm1111_vm3, %v2544_v34, 0.0 }
 0x7d3   : > { %1695 = vadd.xlane.f32.xlu0 %v1694_v35 }
 0x83e   : > { %v1693_v36 = vpop.xlane.xlu2 %1692 }
 0x83f   : > { %2545 = vrcp.f32 %v1693_v36  ;;  %v2511_v36 = vld [vmem:[%s3079_s18] ss:$0 sm:$0xff] }
 0x845   : > { %v2546_v38 = vpop.eup %2545 }
 0x846   : > { %v1696_v37 = vpop.xlane.xlu0 %1695  ;;  %v1699_v40 = vmul.f32 %v2546_v38, %v2542_v31 }
 0x847   : > { %2547 = vrcp.f32 %v1696_v37 }
 0x848   : > { %2549 = vrcp.f32 %v2572_v59 }
 0x84d   : > { %v2548_v39 = vpop.eup %2547 }
 0x84e   : > { %v1700_v41 = vmul.f32 %v2548_v39, %v2544_v34  ;;  %v2550_v60 = vpop.eup %2549 }
 0x84f   : > { %v1760_v61 = vmul.f32 32.0, %v2550_v60  ;;  %vm1764_vm5 = vweird.f32 %v2550_v60 }
 0x850   : > { %v1701_v42 = vpack.c.bf16 %v1700_v41, %v1699_v40 }
 0x851   : > { %v1761_v62 = vsub.f32 1.0, %v1760_v61 }
 0x852   : > { %2406 = vmatmul.msk.bf16.vlgmr.msrb.gmra.mxu2 %vm1111_vm3, %v1701_v42 }
 0x853   : > { %v1762_v63 = vmul.f32 %v2550_v60, %v1761_v62 }
 0x855   : > { %v1763_v0 = vadd.f32 %v2550_v60, %v1762_v63 }
 0x8d5   : > { %v1715_v45 = vpop.f32.mrf.mxu2 }
 0x8dd   : > { %v1717_v46 = vpop.f32.mrf.mxu2 }
 0x8de   : > { %v1720_v47 = vpack.c.bf16 %v1717_v46, %v1715_v45  ;;  %v2480_v45 = vld [vmem:[%s2764_s28 + $0x8] sm:$0xff]  ;;  %v2479_v46 = vld [vmem:[%s2764_s28] sm:$0xff] }
 0x8df   : > { %1917 = vmatpush.bf16.msra.mxu1 %v2480_v45  ;;  %v2515_v45 = vld [vmem:[%s893_s11] ss:$0 sm:$0xff] }
 0x8e0   : > { %2407 = vmatmul.msk.bf16.vlgmr.msra.gmra.mxu3 %vm1071_vm2, %v1720_v47  ;;  %v2512_v47 = vld [vmem:[%s3081_s22] ss:$0 sm:$0xff] }
 0x8e3   : > { %1918 = vmatpush.bf16.msra.mxu1 %v2479_v46 }
 0x963   : > { %v1736_v49 = vpop.f32.mrf.mxu3 }
 0x964   : > { %v1741_v50 = vadd.f32 %v1736_v49, %v1551_v7 }
 0x966   : > { %v1747_v51 = vadd.f32 %v2509_v48, %v1741_v50 }
 0x968   : > { %v1749_v52 = vadd.f32 %v1747_v51, %v2785_v8  ;;  %v2939_v8 = vsel %vm1764_vm5, %v2550_v60, %v1763_v0 }
 0x96a   : > { %v1753_v53 = vsel %vm995_vm1, %v1749_v52, 0.0 }
 0x96b   : > { %v1738_v54 = vpop.f32.mrf.mxu3  ;;  %1754 = vadd.xlane.f32.xlu1 %v1753_v53 }
 0x96c   : > { %v1742_v55 = vadd.f32 %v1738_v54, %v1552_v14 }
 0x96e   : > { %v1748_v56 = vadd.f32 %v2509_v48, %v1742_v55 }
 0x970   : > { %v1750_v57 = vadd.f32 %v1748_v56, %v2788_v10 }
 0x972   : > { %v1756_v58 = vsel %vm995_vm1, %v1750_v57, 0.0 }
 0x973   : > { %1757 = vadd.xlane.f32.xlu2 %v1756_v58 }
 0x9de   : > { %v1755_v1 = vpop.xlane.xlu1 %1754 }
 0x9df   : > { %v1766_v2 = vmul.f32 %v2939_v8, %v1755_v1 }
 0x9e1   : > { %v1768_v3 = vsub.f32 %v1749_v52, %v1766_v2 }
 0x9e3   : > { %v1770_v10 = vmul.f32 %v1768_v3, %v1768_v3 }
 0x9e5   : > { %v1772_v4 = vsel %vm995_vm1, %v1770_v10, 0.0 }
 0x9e6   : > { %v1758_v6 = vpop.xlane.xlu2 %1757  ;;  %1773 = vadd.xlane.f32.xlu0 %v1772_v4 }
 0x9e7   : > { %v1767_v7 = vmul.f32 %v2939_v8, %v1758_v6 }
 0x9e9   : > { %v1769_v12 = vsub.f32 %v1750_v57, %v1767_v7  ;;  %v2513_v7 = vld [vmem:[%s887_s3] ss:$0 sm:$0xff] }
 0x9eb   : > { %v1771_v13 = vmul.f32 %v1769_v12, %v1769_v12 }
 0x9ed   : > { %v1775_v14 = vsel %vm995_vm1, %v1771_v13, 0.0 }
 0x9ee   : > { %1776 = vadd.xlane.f32.xlu1 %v1775_v14 }
 0xa59   : > { %v1774_v16 = vpop.xlane.xlu0 %1773 }
 0xa5a   : > { %v1778_v17 = vmul.f32 %v1774_v16, %v2939_v8 }
 0xa5c   : > { %v1780_v18 = vadd.f32 1e-12, %v1778_v17 }
 0xa5e   : > { %2551 = vrsqrt.f32 %v1780_v18  ;;  %vm1788_vm7 = vweird.f32 %v1780_v18 }
 0xa61   : > { %v1777_v19 = vpop.xlane.xlu1 %1776 }
 0xa62   : > { %v1779_v20 = vmul.f32 %v1777_v19, %v2939_v8 }
 0xa64   : > { %v2552_v22 = vpop.eup %2551  ;;  %v1781_v9 = vadd.f32 1e-12, %v1779_v20 }
 0xa65   : > { %v1783_v21 = vmul.f32 %v2552_v22, %v1780_v18  ;;  %vm1789_vm6 = vweird.f32 %v2552_v22 }
 0xa66   : > { %2553 = vrsqrt.f32 %v1781_v9  ;;  %vm1790_vm8 = vmor %vm1788_vm7, %vm1789_vm6  ;;  %vm1798_vm10 = vweird.f32 %v1781_v9 }
 0xa67   : > { %v1784_v23 = vmul.f32 %v2552_v22, %v1783_v21 }
 0xa69   : > { %v1785_v11 = vmul.f32 0.5, %v1784_v23 }
 0xa6b   : > { %v1786_v24 = vsub.f32 1.5, %v1785_v11 }
 0xa6c   : > { %v2554_v25 = vpop.eup %2553 }
 0xa6d   : > { %v1787_v26 = vmul.f32 %v2552_v22, %v1786_v24  ;;  %v1793_v28 = vmul.f32 %v2554_v25, %v1781_v9  ;;  %vm1799_vm9 = vweird.f32 %v2554_v25 }
 0xa6e   : > { %vm1800_vm11 = vmor %vm1798_vm10, %vm1799_vm9 }
 0xa6f   : > { %v1794_v27 = vmul.f32 %v2554_v25, %v1793_v28  ;;  %v1791_v29 = vsel %vm1790_vm8, %v2552_v22, %v1787_v26  ;;  %v2484_v28 = vld [vmem:[%s3082_s7 + $0x8] sm:$0xff] }
 0xa70   : > { %v1802_v32 = vmul.f32 %v1791_v29, %v1768_v3  ;;  %2015 = vmatpush.bf16.msra.mxu2 %v2484_v28 }
 0xa71   : > { %v1795_v30 = vmul.f32 0.5, %v1794_v27 }
 0xa72   : > { %v1807_v37 = vmul.f32 %v2510_v33, %v1802_v32 }
 0xa73   : > { %v1796_v31 = vsub.f32 1.5, %v1795_v30  ;;  %v2483_v30 = vld [vmem:[%s3082_s7] sm:$0xff] }
 0xa74   : > { %v1812_v40 = vadd.f32 %v2511_v36, %v1807_v37  ;;  %2016 = vmatpush.bf16.msra.mxu2 %v2483_v30 }
 0xa75   : > { %v1797_v34 = vmul.f32 %v2554_v25, %v1796_v31 }
 0xa77   : > { %v1801_v35 = vsel %vm1800_vm11, %v2554_v25, %v1797_v34 }
 0xa78   : > { %v1803_v38 = vmul.f32 %v1801_v35, %v1769_v12 }
 0xa7a   : > { %v1808_v39 = vmul.f32 %v2510_v33, %v1803_v38 }
 0xa7c   : > { %v1813_v41 = vadd.f32 %v2511_v36, %v1808_v39 }
 0xa7e   : > { %v1814_v42 = vpack.c.bf16 %v1813_v41, %v1812_v40 }
 0xa80   : > { %2416 = vmatmul.msk.bf16.vlgmr.msra.gmra.mxu0 %vm995_vm1, %v1814_v42 }
 0xafd   : > { %v1847_v48 = vpop.f32.mrf.mxu0 }
 0xafe   : > { %v1848_v49 = vadd.f32 %v2512_v47, %v1847_v48 }
 0xb00   : > { %v1854_v50 = vmul.f32 0.044715, %v1848_v49  ;;  %v1852_v1 = vmul.f32 0.5, %v1848_v49 }
 0xb02   : > { %v1856_v51 = vmul.f32 %v1854_v50, %v1848_v49 }
 0xb04   : > { %v1858_v52 = vmul.f32 %v1856_v51, %v1848_v49 }
 0xb05   : > { %v1849_v53 = vpop.f32.mrf.mxu0 }
 0xb06   : > { %v1860_v54 = vadd.f32 %v1858_v52, %v1848_v49  ;;  %v1850_v55 = vadd.f32 %v2512_v47, %v1849_v53 }
 0xb08   : > { %v1855_v56 = vmul.f32 0.044715, %v1850_v55  ;;  %v1862_v57 = vmul.f32 0.7978846, %v1860_v54  ;;  %v1853_v2 = vmul.f32 0.5, %v1850_v55 }
 0xb0a   : > { %v1857_v58 = vmul.f32 %v1855_v56, %v1850_v55  ;;  %2555 = vtanh.f32 %v1862_v57  ;;  %v2516_v57 = vld [vmem:[%s3084_s30] ss:$0 sm:$0xff] }
 0xb0c   : > { %v1859_v59 = vmul.f32 %v1857_v58, %v1850_v55 }
 0xb0e   : > { %v1861_v60 = vadd.f32 %v1859_v59, %v1850_v55 }
 0xb10   : > { %v1863_v61 = vmul.f32 0.7978846, %v1861_v60  ;;  %v2556_v62 = vpop.eup %2555 }
 0xb11   : > { %v1866_v63 = vadd.f32 1.0, %v2556_v62 }
 0xb12   : > { %2557 = vtanh.f32 %v1863_v61 }
 0xb13   : > { %v1868_v10 = vmul.f32 %v1866_v63, %v1852_v1 }
 0xb18   : > { %v2558_v0 = vpop.eup %2557 }
 0xb19   : > { %v1867_v3 = vadd.f32 1.0, %v2558_v0 }
 0xb1b   : > { %v1869_v4 = vmul.f32 %v1867_v3, %v1853_v2 }
 0xb1d   : > { %v1870_v6 = vpack.c.bf16 %v1869_v4, %v1868_v10 }
 0xb1f   : > { %2433 = vmatmul.msk.bf16.vlgmr.msra.gmra.mxu1 %vm1907_vm12, %v1870_v6 }
 0xb9c   : > { %v1920_v12 = vpop.f32.mrf.mxu1 }
 0xb9d   : > { %v1921_v13 = vadd.f32 %v2513_v7, %v1920_v12 }
 0xb9f   : > { %v1925_v14 = vadd.f32 %v1921_v13, %v1812_v40 }
 0xba1   : > { %v1929_v15 = vsel %vm995_vm1, %v1925_v14, 0.0 }
 0xba2   : > { %1930 = vadd.xlane.f32.xlu2 %v1929_v15 }
 0xba4   : > { %v1922_v16 = vpop.f32.mrf.mxu1 }
 0xba5   : > { %v1923_v17 = vadd.f32 %v2513_v7, %v1922_v16 }
 0xba7   : > { %v1926_v5 = vadd.f32 %v1923_v17, %v1813_v41 }
 0xba9   : > { %v1932_v18 = vsel %vm995_vm1, %v1926_v5, 0.0 }
 0xbaa   : > { %1933 = vadd.xlane.f32.xlu0 %v1932_v18 }
 0xc15   : > { %v1931_v19 = vpop.xlane.xlu2 %1930 }
 0xc16   : > { %v1935_v20 = vmul.f32 %v1931_v19, %v2939_v8 }
 0xc18   : > { %v1937_v22 = vsub.f32 %v1925_v14, %v1935_v20 }
 0xc1a   : > { %v1939_v9 = vmul.f32 %v1937_v22, %v1937_v22 }
 0xc1c   : > { %v1941_v21 = vsel %vm995_vm1, %v1939_v9, 0.0 }
 0xc1d   : > { %v1934_v23 = vpop.xlane.xlu0 %1933  ;;  %1942 = vadd.xlane.f32.xlu1 %v1941_v21 }
 0xc1e   : > { %v1936_v11 = vmul.f32 %v1934_v23, %v2939_v8 }
 0xc20   : > { %v1938_v24 = vsub.f32 %v1926_v5, %v1936_v11 }
 0xc22   : > { %v1940_v25 = vmul.f32 %v1938_v24, %v1938_v24 }
 0xc24   : > { %v1944_v26 = vsel %vm995_vm1, %v1940_v25, 0.0 }
 0xc25   : > { %1945 = vadd.xlane.f32.xlu2 %v1944_v26 }
 0xc90   : > { %v1943_v27 = vpop.xlane.xlu1 %1942 }
 0xc91   : > { %v1947_v29 = vmul.f32 %v1943_v27, %v2939_v8 }
 0xc93   : > { %v1949_v31 = vadd.f32 1e-12, %v1947_v29 }
 0xc95   : > { %2559 = vrsqrt.f32 %v1949_v31  ;;  %vm1957_vm14 = vweird.f32 %v1949_v31 }
 0xc98   : > { %v1946_v33 = vpop.xlane.xlu2 %1945 }
 0xc99   : > { %v1948_v32 = vmul.f32 %v1946_v33, %v2939_v8 }
 0xc9b   : > { %v2560_v34 = vpop.eup %2559  ;;  %v1950_v35 = vadd.f32 1e-12, %v1948_v32 }
 0xc9c   : > { %v1952_v36 = vmul.f32 %v2560_v34, %v1949_v31  ;;  %vm1958_vm13 = vweird.f32 %v2560_v34 }
 0xc9d   : > { %2561 = vrsqrt.f32 %v1950_v35  ;;  %vm1959_vm15 = vmor %vm1957_vm14, %vm1958_vm13  ;;  %vm1967_vm2 = vweird.f32 %v1950_v35 }
 0xc9e   : > { %v1953_v37 = vmul.f32 %v2560_v34, %v1952_v36 }
 0xca0   : > { %v1954_v38 = vmul.f32 0.5, %v1953_v37 }
 0xca2   : > { %v1955_v39 = vsub.f32 1.5, %v1954_v38 }
 0xca3   : > { %v2562_v40 = vpop.eup %2561 }
 0xca4   : > { %v1956_v41 = vmul.f32 %v2560_v34, %v1955_v39  ;;  %v1962_v42 = vmul.f32 %v2562_v40, %v1950_v35  ;;  %vm1968_vm0 = vweird.f32 %v2562_v40 }
 0xca5   : > { %vm1969_vm3 = vmor %vm1967_vm2, %vm1968_vm0 }
 0xca6   : > { %v1960_v8 = vsel %vm1959_vm15, %v2560_v34, %v1956_v41  ;;  %v1963_v44 = vmul.f32 %v2562_v40, %v1962_v42 }
 0xca7   : > { %v1971_v46 = vmul.f32 %v1960_v8, %v1937_v22 }
 0xca8   : > { %v1964_v47 = vmul.f32 0.5, %v1963_v44 }
 0xca9   : > { %v1976_v48 = vmul.f32 %v2514_v43, %v1971_v46 }
 0xcaa   : > { %v1965_v49 = vsub.f32 1.5, %v1964_v47 }
 0xcab   : > { %v1981_v50 = vadd.f32 %v2515_v45, %v1976_v48 }
 0xcac   : > { %v1966_v51 = vmul.f32 %v2562_v40, %v1965_v49 }
 0xcad   : > { %1983 = vst.msk [vmem:[#allocation2] sm:$0xff] %vm995_vm1, %v1981_v50 }
 0xcae   : > { %v1970_v52 = vsel %vm1969_vm3, %v2562_v40, %v1966_v51 }
 0xcaf   : > { %v1972_v53 = vmul.f32 %v1970_v52, %v1938_v24 }
 0xcb1   : > { %v1977_v54 = vmul.f32 %v2514_v43, %v1972_v53 }
 0xcb3   : > { %v1982_v55 = vadd.f32 %v2515_v45, %v1977_v54 }
 0xcb5   : > { %1984 = vst.msk [vmem:[#allocation2 + $0x8] sm:$0xff] %vm995_vm1, %v1982_v55  ;;  %v1985_v56 = vpack.c.bf16 %v1982_v55, %v1981_v50 }
 0xcb7   : > { %2442 = vmatmul.msk.bf16.vlgmr.msra.gmra.mxu2 %vm995_vm1, %v1985_v56 }
 0xd3a   : > { %v2018_v58 = vpop.f32.mrf.mxu2 }
 0xd3b   : > { %v2019_v59 = vadd.f32 %v2516_v57, %v2018_v58 }
 0xd3d   : > { %2023 = vst [vmem:[%s2777_s13] sm:$0xff] %v2019_v59 }
 0xd42   : > { %v2020_v60 = vpop.f32.mrf.mxu2 }
 0xd43   : > { %v2021_v61 = vadd.f32 %v2516_v57, %v2020_v60 }
 0xd45   : > { %2024 = vst [vmem:[%s2777_s13 + $0x8] sm:$0xff] %v2021_v61 }
 0xd46 PF: > { %s3085_s1 = sld [smem:[#allocation3_spill]] }
 0xd4c   : > { %s30_s1 = sadd.s32 1, %s3085_s1  }
 0xd4d   : > { %p27_p5 = scmp.ge.s32.totalorder %s30_s1, 5  }
 0xd4f   :  { %29 = sbr.rel (!%p27_p5) target bundleno = 17 (0x11), region = 182 }

</bundles_post_ra>
